<compile_context>
chip_gen: v6e
topology: v6e:2x2x1
jax: 0.10.0
libtpu: 0.0.40
codegen_flags: <defaults>
</compile_context>

<pallas_src>
import functools

import numpy as np
import jax
import jax.numpy as jnp
from jax.experimental import pallas as pl


# ----------------------------------------------------------------------------
# Fused forward kernel (no grid; everything resident in VMEM)
# ----------------------------------------------------------------------------
def _vit2_fused_kernel(patches_ref, wconv_ref, bconv_ref, tokbase_ref, abias_ref,
                       ln1g_ref, ln1b_ref, wqkv_ref, wout_ref, bout_ref,
                       ln2g_ref, ln2b_ref, w1_ref, b1_ref, w2_ref, b2_ref,
                       hg_ref, hb_ref, hw_ref, hbias_ref, o_ref,
                       *, batch, n_pad, depth, heads, dim_head):
    f32 = jnp.float32
    rows = batch * n_pad
    inner = heads * dim_head

    def layer_norm(z, g, b):
        # two-moment form: both lane reductions issue independently
        m1 = jnp.mean(z, axis=-1, keepdims=True)
        m2 = jnp.mean(z * z, axis=-1, keepdims=True)
        var = m2 - m1 * m1
        return (z - m1) * jax.lax.rsqrt(var + 1e-5) * g + b

    # ---- conv stem: ONE im2col matmul over both maxpool phases + bias + ReLU,
    #      then the elementwise max of the two (sublane-aligned) row halves.
    y = jnp.maximum(
        jnp.dot(patches_ref[...], wconv_ref[...], preferred_element_type=f32)
        + bconv_ref[...], 0.0)                               # (2*rows, dim)
    pooled = jnp.maximum(y[:rows, :], y[rows:, :])           # (rows, dim)

    # ---- token assembly: one whole-block add.
    # token_base carries cls+pos[0] (row 0 of each block), pos[1:] (real token
    # rows) and -ReLU(b_conv) on cls/padding rows to cancel the zero-patch bias.
    x = pooled + tokbase_ref[...]                            # (rows, dim)
    # emb dropout: identity (eval)

    a_bias = abias_ref[...]                                  # (rows, rows) block-diag mask

    # ---- transformer layers (depth static; unrolled at trace time)
    for l in range(depth):
        # --- Attention (PreNorm); softmax scale pre-folded into Q cols of wqkv ---
        xn = layer_norm(x, ln1g_ref[l], ln1b_ref[l])
        qkv = jnp.dot(xn, wqkv_ref[l], preferred_element_type=f32)   # (rows, 3*inner)

        heads_out = []
        for h in range(heads):
            c = h * dim_head
            qh = qkv[:, c:c + dim_head]
            kh = qkv[:, inner + c:inner + c + dim_head]
            vh = qkv[:, 2 * inner + c:2 * inner + c + dim_head]
            # q @ k^T (no transpose materialized); both batch elements in one
            # matmul, cross-batch / padded-key entries masked by a_bias.
            dots = jax.lax.dot_general(qh, kh, (((1,), (1,)), ((), ())),
                                       preferred_element_type=f32) + a_bias
            m = jnp.max(dots, axis=-1, keepdims=True)
            e = jnp.exp(dots - m)
            attn = e * pl.reciprocal(jnp.sum(e, axis=-1, keepdims=True), approx=True)
            heads_out.append(jnp.dot(attn, vh, preferred_element_type=f32))  # (rows, dh)

        o_all = jnp.concatenate(heads_out, axis=1)            # (rows, inner), one lane concat
        x = x + jnp.dot(o_all, wout_ref[l], preferred_element_type=f32) + bout_ref[l]

        # --- FeedForward (PreNorm), exact erf-GELU ---
        xn = layer_norm(x, ln2g_ref[l], ln2b_ref[l])
        h1 = jnp.dot(xn, w1_ref[l], preferred_element_type=f32) + b1_ref[l]
        h1 = 0.5 * h1 * (1.0 + jax.lax.erf(h1 * (1.0 / jnp.sqrt(2.0))))
        x = x + jnp.dot(h1, w2_ref[l], preferred_element_type=f32) + b2_ref[l]

    # ---- pool='cls' + mlp_head (LayerNorm + Linear); cls rows sit at aligned
    #      offsets bi*n_pad.
    cls_rows = jnp.concatenate(
        [x[bi * n_pad:bi * n_pad + 1, :] for bi in range(batch)], axis=0)   # (batch, dim)
    xn = layer_norm(cls_rows, hg_ref[...], hb_ref[...])
    o_ref[...] = jnp.dot(xn, hw_ref[...], preferred_element_type=f32) + hbias_ref[...]


# ----------------------------------------------------------------------------
# One-time host-side weight preparation (hoisted out of the jitted path)
# ----------------------------------------------------------------------------
def prepare_operands(params, *, batch, heads, dim_head, n_pad, pool_len):
    dim = params["conv_w"].shape[1]
    inner = heads * dim_head
    n_tok = pool_len + 1
    scale = dim_head ** (-0.5)

    # fold BatchNorm (eval) into conv weight / bias
    s = params["bn_g"] * jax.lax.rsqrt(params["bn_rv"] + 1e-5)             # (1, dim)
    w_conv = params["conv_w"] * s                                          # (K, dim)
    b_conv = (params["conv_b"] - params["bn_rm"]) * s + params["bn_b"]     # (1, dim)

    # token base: cls + pos[0] at row 0 of each block, pos[1:] at the real token
    # rows, and -ReLU(b_conv) at cls/padding rows to cancel the conv(0)=bias leak.
    relu_bc = jnp.maximum(b_conv, 0.0)[0]                                   # (dim,)
    base = jnp.broadcast_to(-relu_bc, (n_pad, dim))
    base = base.at[0].add(params["cls_token"][0, 0] + params["pos_embedding"][0, 0])
    base = base.at[1:n_tok].set(params["pos_embedding"][0, 1:n_tok])
    token_base = jnp.tile(base, (batch, 1)).astype(jnp.float32)             # (batch*n_pad, dim)

    # attention additive bias: block-diagonal over batches, padded key slots masked
    r = jnp.arange(batch * n_pad)
    same_block = (r[:, None] // n_pad) == (r[None, :] // n_pad)
    real_key = (r[None, :] % n_pad) < n_tok
    attn_bias = jnp.where(same_block & real_key, 0.0, -1e30).astype(jnp.float32)

    # stack per-layer weights along depth; fold softmax scale into Q columns
    st = lambda key: jnp.stack([lp[key] for lp in params["layers"]], axis=0)
    wqkv = st("w_qkv")                                                      # (depth, dim, 3*inner)
    wqkv = wqkv.at[:, :, :inner].multiply(scale)

    return (w_conv, b_conv, token_base, attn_bias,
            st("ln1_g"), st("ln1_b"), wqkv, st("w_out"), st("b_out"),
            st("ln2_g"), st("ln2_b"), st("w1"), st("b1"), st("w2"), st("b2"),
            params["head_ln_g"], params["head_ln_b"], params["head_w"], params["head_b"])


# ----------------------------------------------------------------------------
# Jitted forward: tiny per-call im2col + the single fused pallas_call
# ----------------------------------------------------------------------------
def vit2_forward(ops, inputs, *, pool_len, n_pad, conv_len, heads, dim_head,
                 K=19, stride=3, pad=5):
    b = inputs.shape[0]
    dim = ops[0].shape[1]
    depth = ops[6].shape[0]
    inner = ops[7].shape[1]
    mlp_dim = ops[11].shape[2]
    classes = ops[17].shape[1]
    rows = b * n_pad

    # --- im2col producing both maxpool window phases, placed into padded token
    #     slots 1..pool_len of each 16-row block (slots 0 / >pool_len stay zero).
    #     pooled[i] = max over conv positions {2i-1, 2i} clipped to the valid range,
    #     which reproduces MaxPool1d(2, stride=2, padding=1)'s -inf padding.
    pi = np.arange(pool_len)
    conv_pos = np.concatenate([np.clip(2 * pi - 1, 0, conv_len - 1),
                               np.clip(2 * pi, 0, conv_len - 1)])            # (2*pool_len,)
    gidx = conv_pos[:, None] * stride + np.arange(K)[None, :]                # (2*pool_len, K)
    x_pad = jnp.pad(inputs[:, 0, :], ((0, 0), (pad, pad)))
    p = x_pad[:, gidx]                                        # (b, 2*pool_len, K)
    p = p.reshape(b, 2, pool_len, K).transpose(1, 0, 2, 3)    # (2, b, pool_len, K)
    p = jnp.pad(p, ((0, 0), (0, 0), (1, n_pad - pool_len - 1), (0, 0)))
    patches = p.reshape(2 * b * n_pad, K)                     # (2*rows, K)

    flops = 2 * (2 * rows * K * dim
                 + depth * (rows * dim * 3 * inner
                            + heads * 2 * rows * rows * dim_head
                            + rows * inner * dim
                            + 2 * rows * dim * mlp_dim)
                 + b * dim * classes)
    transcendentals = depth * (heads * rows * rows + rows * mlp_dim)
    bytes_accessed = patches.size * 4 + sum(a.size * 4 for a in ops) + b * classes * 4

    kern = functools.partial(_vit2_fused_kernel, batch=b, n_pad=n_pad, depth=depth,
                             heads=heads, dim_head=dim_head)

    return pl.pallas_call(
        kern,
        out_shape=jax.ShapeDtypeStruct((b, classes), jnp.float32),
        cost_estimate=pl.CostEstimate(flops=flops, transcendentals=transcendentals,
                                      bytes_accessed=bytes_accessed),
    )(patches, *ops)


# ----------------------------------------------------------------------------
# Deterministic parameter initialization (shapes from ViT2.__init__)
# ----------------------------------------------------------------------------
def init_params(key, *, length, classes, depth, heads, dim_head, mlp_dim):
    dim = 20
    inner = heads * dim_head
    pool_len = ((length + 5 * 2 - 19) // 3 + 1) // 2 + 1
    keys = iter(jax.random.split(key, 16 + depth * 16))

    def nrm(shape, scale=0.05):
        return (scale * jax.random.normal(next(keys), shape)).astype(jnp.float32)

    p = {
        # Conv1d(1, dim, 19): torch weight (dim,1,19) stored transposed as (19, dim)
        "conv_w": nrm((19, dim)),
        "conv_b": nrm((1, dim)),
        "bn_g": 1.0 + nrm((1, dim), 0.01),
        "bn_b": nrm((1, dim), 0.01),
        "bn_rm": nrm((1, dim), 0.05),
        "bn_rv": 1.0 + jnp.abs(nrm((1, dim), 0.05)),
        "pos_embedding": nrm((1, pool_len + 1, dim), 1.0),
        "cls_token": nrm((1, 1, dim), 1.0),
        "head_ln_g": 1.0 + nrm((1, dim), 0.01),
        "head_ln_b": nrm((1, dim), 0.01),
        "head_w": nrm((dim, classes)),
        "head_b": nrm((1, classes)),
        "layers": [],
    }
    for _ in range(depth):
        p["layers"].append({
            "ln1_g": 1.0 + nrm((1, dim), 0.01),
            "ln1_b": nrm((1, dim), 0.01),
            "w_qkv": nrm((dim, 3 * inner)),          # Linear(dim, inner*3, bias=False), (in,out)
            "w_out": nrm((inner, dim)),              # Linear(inner, dim)
            "b_out": nrm((1, dim)),
            "ln2_g": 1.0 + nrm((1, dim), 0.01),
            "ln2_b": nrm((1, dim), 0.01),
            "w1": nrm((dim, mlp_dim)),               # Linear(dim, mlp_dim)
            "b1": nrm((1, mlp_dim)),
            "w2": nrm((mlp_dim, dim)),               # Linear(mlp_dim, dim)
            "b2": nrm((1, dim)),
        })
    return p


if __name__ == "__main__":
    # small hyperparameters consistent with ViT2.__init__
    length, classes, depth, heads, dim_head, mlp_dim = 64, 5, 2, 2, 16, 32
    batch = 2
    K, stride, pad = 19, 3, 5
    conv_len = (length + 2 * pad - K) // stride + 1
    pool_len = conv_len // 2 + 1                 # MaxPool1d(2, stride=2, padding=1)
    n_tok = pool_len + 1
    n_pad = ((n_tok + 7) // 8) * 8               # 11 -> 16: sublane-aligned token blocks

    key = jax.random.PRNGKey(0)
    k_params, k_input = jax.random.split(key)
    params = init_params(k_params, length=length, classes=classes, depth=depth,
                         heads=heads, dim_head=dim_head, mlp_dim=mlp_dim)

    # PyTorch Conv1d input layout: (batch, channels=1, length)
    inputs = jax.random.normal(k_input, (batch, 1, length), dtype=jnp.float32)

    # one-time host-side weight prep (BN fold, cls+pos fold, scale fold, stacking,
    # masks) — hoisted out of the jitted per-call path.
    ops = prepare_operands(params, batch=batch, heads=heads, dim_head=dim_head,
                           n_pad=n_pad, pool_len=pool_len)

    fwd = jax.jit(functools.partial(vit2_forward, pool_len=pool_len, n_pad=n_pad,
                                    conv_len=conv_len, heads=heads, dim_head=dim_head))
    logits = fwd(ops, inputs)
    jax.block_until_ready(logits)
    assert logits.shape == (batch, classes)
    print("KERNEL_OK")
</pallas_src>

<mosaic_0001>
module attributes {stable_mosaic.version = 11 : i64} {
  func.func @_vit2_fused_kernel(%arg0: memref<64x19xf32, #tpu.memory_space<vmem>>, %arg1: memref<19x20xf32, #tpu.memory_space<vmem>>, %arg2: memref<1x20xf32, #tpu.memory_space<vmem>>, %arg3: memref<32x20xf32, #tpu.memory_space<vmem>>, %arg4: memref<32x32xf32, #tpu.memory_space<vmem>>, %arg5: memref<2x1x20xf32, #tpu.memory_space<vmem>>, %arg6: memref<2x1x20xf32, #tpu.memory_space<vmem>>, %arg7: memref<2x20x96xf32, #tpu.memory_space<vmem>>, %arg8: memref<2x32x20xf32, #tpu.memory_space<vmem>>, %arg9: memref<2x1x20xf32, #tpu.memory_space<vmem>>, %arg10: memref<2x1x20xf32, #tpu.memory_space<vmem>>, %arg11: memref<2x1x20xf32, #tpu.memory_space<vmem>>, %arg12: memref<2x20x32xf32, #tpu.memory_space<vmem>>, %arg13: memref<2x1x32xf32, #tpu.memory_space<vmem>>, %arg14: memref<2x32x20xf32, #tpu.memory_space<vmem>>, %arg15: memref<2x1x20xf32, #tpu.memory_space<vmem>>, %arg16: memref<1x20xf32, #tpu.memory_space<vmem>>, %arg17: memref<1x20xf32, #tpu.memory_space<vmem>>, %arg18: memref<20x5xf32, #tpu.memory_space<vmem>>, %arg19: memref<1x5xf32, #tpu.memory_space<vmem>>, %arg20: memref<2x5xf32, #tpu.memory_space<vmem>>) attributes {dimension_semantics = [], scalar_prefetch = 0 : i64, scratch_operands = 0 : i64, tpu.core_type = #tpu.core_type<tc>} {
    %c0 = arith.constant 0 : index
    %c0_0 = arith.constant 0 : index
    %0 = vector.load %arg0[%c0, %c0_0] : memref<64x19xf32, #tpu.memory_space<vmem>>, vector<64x19xf32>
    %c0_1 = arith.constant 0 : index
    %c0_2 = arith.constant 0 : index
    %1 = vector.load %arg1[%c0_1, %c0_2] : memref<19x20xf32, #tpu.memory_space<vmem>>, vector<19x20xf32>
    %cst = arith.constant dense<0.000000e+00> : vector<64x20xf32>
    %2 = tpu.matmul %0, %1, %cst {dimension_numbers = #tpu.dot_dimension_numbers<[1], [0], [0], [1], [0, 0, 1, 1], [], []>} : vector<64x19xf32>, vector<19x20xf32>, vector<64x20xf32> -> vector<64x20xf32>
    %c0_3 = arith.constant 0 : index
    %c0_4 = arith.constant 0 : index
    %3 = vector.load %arg2[%c0_3, %c0_4] : memref<1x20xf32, #tpu.memory_space<vmem>>, vector<1x20xf32>
    %4 = vector.broadcast %3 : vector<1x20xf32> to vector<64x20xf32>
    %5 = arith.addf %2, %4 : vector<64x20xf32>
    %cst_5 = arith.constant 0.000000e+00 : f32
    %6 = vector.broadcast %cst_5 : f32 to vector<64x20xf32>
    %7 = arith.maximumf %5, %6 : vector<64x20xf32>
    %8 = vector.extract_strided_slice %7 {offsets = [0, 0], sizes = [32, 20], strides = [1, 1]} : vector<64x20xf32> to vector<32x20xf32>
    %9 = vector.extract_strided_slice %7 {offsets = [32, 0], sizes = [32, 20], strides = [1, 1]} : vector<64x20xf32> to vector<32x20xf32>
    %10 = arith.maximumf %8, %9 : vector<32x20xf32>
    %c0_6 = arith.constant 0 : index
    %c0_7 = arith.constant 0 : index
    %11 = vector.load %arg3[%c0_6, %c0_7] : memref<32x20xf32, #tpu.memory_space<vmem>>, vector<32x20xf32>
    %12 = arith.addf %10, %11 : vector<32x20xf32>
    %c0_8 = arith.constant 0 : index
    %c0_9 = arith.constant 0 : index
    %13 = vector.load %arg4[%c0_8, %c0_9] : memref<32x32xf32, #tpu.memory_space<vmem>>, vector<32x32xf32>
    %c0_10 = arith.constant 0 : index
    %c0_11 = arith.constant 0 : index
    %c0_12 = arith.constant 0 : index
    %14 = vector.load %arg5[%c0_10, %c0_11, %c0_12] : memref<2x1x20xf32, #tpu.memory_space<vmem>>, vector<1x1x20xf32>
    %15 = vector.shape_cast %14 : vector<1x1x20xf32> to vector<1x20xf32>
    %c0_13 = arith.constant 0 : index
    %c0_14 = arith.constant 0 : index
    %c0_15 = arith.constant 0 : index
    %16 = vector.load %arg6[%c0_13, %c0_14, %c0_15] : memref<2x1x20xf32, #tpu.memory_space<vmem>>, vector<1x1x20xf32>
    %17 = vector.shape_cast %16 : vector<1x1x20xf32> to vector<1x20xf32>
    %cst_16 = arith.constant dense<0.000000e+00> : vector<32xf32>
    %18 = vector.multi_reduction <add>, %12, %cst_16 [1] : vector<32x20xf32> to vector<32xf32>
    %19 = vector.shape_cast %18 : vector<32xf32> to vector<32x1xf32>
    %cst_17 = arith.constant 2.000000e+01 : f32
    %20 = vector.broadcast %cst_17 : f32 to vector<32x1xf32>
    %21 = arith.divf %19, %20 : vector<32x1xf32>
    %22 = arith.mulf %12, %12 : vector<32x20xf32>
    %cst_18 = arith.constant dense<0.000000e+00> : vector<32xf32>
    %23 = vector.multi_reduction <add>, %22, %cst_18 [1] : vector<32x20xf32> to vector<32xf32>
    %24 = vector.shape_cast %23 : vector<32xf32> to vector<32x1xf32>
    %cst_19 = arith.constant 2.000000e+01 : f32
    %25 = vector.broadcast %cst_19 : f32 to vector<32x1xf32>
    %26 = arith.divf %24, %25 : vector<32x1xf32>
    %27 = arith.mulf %21, %21 : vector<32x1xf32>
    %28 = arith.subf %26, %27 : vector<32x1xf32>
    %29 = vector.broadcast %21 : vector<32x1xf32> to vector<32x20xf32>
    %30 = arith.subf %12, %29 : vector<32x20xf32>
    %cst_20 = arith.constant 9.99999974E-6 : f32
    %31 = vector.broadcast %cst_20 : f32 to vector<32x1xf32>
    %32 = arith.addf %28, %31 : vector<32x1xf32>
    %33 = math.rsqrt %32 : vector<32x1xf32>
    %34 = vector.broadcast %33 : vector<32x1xf32> to vector<32x20xf32>
    %35 = arith.mulf %30, %34 : vector<32x20xf32>
    %36 = vector.broadcast %15 : vector<1x20xf32> to vector<32x20xf32>
    %37 = arith.mulf %35, %36 : vector<32x20xf32>
    %38 = vector.broadcast %17 : vector<1x20xf32> to vector<32x20xf32>
    %39 = arith.addf %37, %38 : vector<32x20xf32>
    %c0_21 = arith.constant 0 : index
    %c0_22 = arith.constant 0 : index
    %c0_23 = arith.constant 0 : index
    %40 = vector.load %arg7[%c0_21, %c0_22, %c0_23] : memref<2x20x96xf32, #tpu.memory_space<vmem>>, vector<1x20x96xf32>
    %41 = vector.shape_cast %40 : vector<1x20x96xf32> to vector<20x96xf32>
    %cst_24 = arith.constant dense<0.000000e+00> : vector<32x96xf32>
    %42 = tpu.matmul %39, %41, %cst_24 {dimension_numbers = #tpu.dot_dimension_numbers<[1], [0], [0], [1], [0, 0, 1, 1], [], []>} : vector<32x20xf32>, vector<20x96xf32>, vector<32x96xf32> -> vector<32x96xf32>
    %43 = vector.extract_strided_slice %42 {offsets = [0, 0], sizes = [32, 16], strides = [1, 1]} : vector<32x96xf32> to vector<32x16xf32>
    %44 = vector.extract_strided_slice %42 {offsets = [0, 32], sizes = [32, 16], strides = [1, 1]} : vector<32x96xf32> to vector<32x16xf32>
    %45 = vector.extract_strided_slice %42 {offsets = [0, 64], sizes = [32, 16], strides = [1, 1]} : vector<32x96xf32> to vector<32x16xf32>
    %cst_25 = arith.constant dense<0.000000e+00> : vector<32x32xf32>
    %46 = tpu.matmul %43, %44, %cst_25 {dimension_numbers = #tpu.dot_dimension_numbers<[1], [1], [0], [0], [0, 0, 1, 0], [], []>} : vector<32x16xf32>, vector<32x16xf32>, vector<32x32xf32> -> vector<32x32xf32>
    %47 = arith.addf %46, %13 : vector<32x32xf32>
    %cst_26 = arith.constant dense<0xFF800000> : vector<32xf32>
    %48 = vector.multi_reduction <maximumf>, %47, %cst_26 [1] : vector<32x32xf32> to vector<32xf32>
    %49 = vector.shape_cast %48 : vector<32xf32> to vector<32x1xf32>
    %50 = vector.broadcast %49 : vector<32x1xf32> to vector<32x32xf32>
    %51 = arith.subf %47, %50 : vector<32x32xf32>
    %52 = math.exp %51 : vector<32x32xf32>
    %cst_27 = arith.constant dense<0.000000e+00> : vector<32xf32>
    %53 = vector.multi_reduction <add>, %52, %cst_27 [1] : vector<32x32xf32> to vector<32xf32>
    %54 = vector.shape_cast %53 : vector<32xf32> to vector<32x1xf32>
    %55 = tpu.reciprocal %54 {approx = true} : vector<32x1xf32> -> vector<32x1xf32>
    %56 = vector.broadcast %55 : vector<32x1xf32> to vector<32x32xf32>
    %57 = arith.mulf %52, %56 : vector<32x32xf32>
    %cst_28 = arith.constant dense<0.000000e+00> : vector<32x16xf32>
    %58 = tpu.matmul %57, %45, %cst_28 {dimension_numbers = #tpu.dot_dimension_numbers<[1], [0], [0], [1], [0, 0, 1, 1], [], []>} : vector<32x32xf32>, vector<32x16xf32>, vector<32x16xf32> -> vector<32x16xf32>
    %59 = vector.extract_strided_slice %42 {offsets = [0, 16], sizes = [32, 16], strides = [1, 1]} : vector<32x96xf32> to vector<32x16xf32>
    %60 = vector.extract_strided_slice %42 {offsets = [0, 48], sizes = [32, 16], strides = [1, 1]} : vector<32x96xf32> to vector<32x16xf32>
    %61 = vector.extract_strided_slice %42 {offsets = [0, 80], sizes = [32, 16], strides = [1, 1]} : vector<32x96xf32> to vector<32x16xf32>
    %cst_29 = arith.constant dense<0.000000e+00> : vector<32x32xf32>
    %62 = tpu.matmul %59, %60, %cst_29 {dimension_numbers = #tpu.dot_dimension_numbers<[1], [1], [0], [0], [0, 0, 1, 0], [], []>} : vector<32x16xf32>, vector<32x16xf32>, vector<32x32xf32> -> vector<32x32xf32>
    %63 = arith.addf %62, %13 : vector<32x32xf32>
    %cst_30 = arith.constant dense<0xFF800000> : vector<32xf32>
    %64 = vector.multi_reduction <maximumf>, %63, %cst_30 [1] : vector<32x32xf32> to vector<32xf32>
    %65 = vector.shape_cast %64 : vector<32xf32> to vector<32x1xf32>
    %66 = vector.broadcast %65 : vector<32x1xf32> to vector<32x32xf32>
    %67 = arith.subf %63, %66 : vector<32x32xf32>
    %68 = math.exp %67 : vector<32x32xf32>
    %cst_31 = arith.constant dense<0.000000e+00> : vector<32xf32>
    %69 = vector.multi_reduction <add>, %68, %cst_31 [1] : vector<32x32xf32> to vector<32xf32>
    %70 = vector.shape_cast %69 : vector<32xf32> to vector<32x1xf32>
    %71 = tpu.reciprocal %70 {approx = true} : vector<32x1xf32> -> vector<32x1xf32>
    %72 = vector.broadcast %71 : vector<32x1xf32> to vector<32x32xf32>
    %73 = arith.mulf %68, %72 : vector<32x32xf32>
    %cst_32 = arith.constant dense<0.000000e+00> : vector<32x16xf32>
    %74 = tpu.matmul %73, %61, %cst_32 {dimension_numbers = #tpu.dot_dimension_numbers<[1], [0], [0], [1], [0, 0, 1, 1], [], []>} : vector<32x32xf32>, vector<32x16xf32>, vector<32x16xf32> -> vector<32x16xf32>
    %75 = tpu.concatenate %58, %74 in 1 : vector<32x16xf32>, vector<32x16xf32> -> vector<32x32xf32>
    %c0_33 = arith.constant 0 : index
    %c0_34 = arith.constant 0 : index
    %c0_35 = arith.constant 0 : index
    %76 = vector.load %arg8[%c0_33, %c0_34, %c0_35] : memref<2x32x20xf32, #tpu.memory_space<vmem>>, vector<1x32x20xf32>
    %77 = vector.shape_cast %76 : vector<1x32x20xf32> to vector<32x20xf32>
    %cst_36 = arith.constant dense<0.000000e+00> : vector<32x20xf32>
    %78 = tpu.matmul %75, %77, %cst_36 {dimension_numbers = #tpu.dot_dimension_numbers<[1], [0], [0], [1], [0, 0, 1, 1], [], []>} : vector<32x32xf32>, vector<32x20xf32>, vector<32x20xf32> -> vector<32x20xf32>
    %79 = arith.addf %12, %78 : vector<32x20xf32>
    %c0_37 = arith.constant 0 : index
    %c0_38 = arith.constant 0 : index
    %c0_39 = arith.constant 0 : index
    %80 = vector.load %arg9[%c0_37, %c0_38, %c0_39] : memref<2x1x20xf32, #tpu.memory_space<vmem>>, vector<1x1x20xf32>
    %81 = vector.shape_cast %80 : vector<1x1x20xf32> to vector<1x20xf32>
    %82 = vector.broadcast %81 : vector<1x20xf32> to vector<32x20xf32>
    %83 = arith.addf %79, %82 : vector<32x20xf32>
    %c0_40 = arith.constant 0 : index
    %c0_41 = arith.constant 0 : index
    %c0_42 = arith.constant 0 : index
    %84 = vector.load %arg10[%c0_40, %c0_41, %c0_42] : memref<2x1x20xf32, #tpu.memory_space<vmem>>, vector<1x1x20xf32>
    %85 = vector.shape_cast %84 : vector<1x1x20xf32> to vector<1x20xf32>
    %c0_43 = arith.constant 0 : index
    %c0_44 = arith.constant 0 : index
    %c0_45 = arith.constant 0 : index
    %86 = vector.load %arg11[%c0_43, %c0_44, %c0_45] : memref<2x1x20xf32, #tpu.memory_space<vmem>>, vector<1x1x20xf32>
    %87 = vector.shape_cast %86 : vector<1x1x20xf32> to vector<1x20xf32>
    %cst_46 = arith.constant dense<0.000000e+00> : vector<32xf32>
    %88 = vector.multi_reduction <add>, %83, %cst_46 [1] : vector<32x20xf32> to vector<32xf32>
    %89 = vector.shape_cast %88 : vector<32xf32> to vector<32x1xf32>
    %cst_47 = arith.constant 2.000000e+01 : f32
    %90 = vector.broadcast %cst_47 : f32 to vector<32x1xf32>
    %91 = arith.divf %89, %90 : vector<32x1xf32>
    %92 = arith.mulf %83, %83 : vector<32x20xf32>
    %cst_48 = arith.constant dense<0.000000e+00> : vector<32xf32>
    %93 = vector.multi_reduction <add>, %92, %cst_48 [1] : vector<32x20xf32> to vector<32xf32>
    %94 = vector.shape_cast %93 : vector<32xf32> to vector<32x1xf32>
    %cst_49 = arith.constant 2.000000e+01 : f32
    %95 = vector.broadcast %cst_49 : f32 to vector<32x1xf32>
    %96 = arith.divf %94, %95 : vector<32x1xf32>
    %97 = arith.mulf %91, %91 : vector<32x1xf32>
    %98 = arith.subf %96, %97 : vector<32x1xf32>
    %99 = vector.broadcast %91 : vector<32x1xf32> to vector<32x20xf32>
    %100 = arith.subf %83, %99 : vector<32x20xf32>
    %cst_50 = arith.constant 9.99999974E-6 : f32
    %101 = vector.broadcast %cst_50 : f32 to vector<32x1xf32>
    %102 = arith.addf %98, %101 : vector<32x1xf32>
    %103 = math.rsqrt %102 : vector<32x1xf32>
    %104 = vector.broadcast %103 : vector<32x1xf32> to vector<32x20xf32>
    %105 = arith.mulf %100, %104 : vector<32x20xf32>
    %106 = vector.broadcast %85 : vector<1x20xf32> to vector<32x20xf32>
    %107 = arith.mulf %105, %106 : vector<32x20xf32>
    %108 = vector.broadcast %87 : vector<1x20xf32> to vector<32x20xf32>
    %109 = arith.addf %107, %108 : vector<32x20xf32>
    %c0_51 = arith.constant 0 : index
    %c0_52 = arith.constant 0 : index
    %c0_53 = arith.constant 0 : index
    %110 = vector.load %arg12[%c0_51, %c0_52, %c0_53] : memref<2x20x32xf32, #tpu.memory_space<vmem>>, vector<1x20x32xf32>
    %111 = vector.shape_cast %110 : vector<1x20x32xf32> to vector<20x32xf32>
    %cst_54 = arith.constant dense<0.000000e+00> : vector<32x32xf32>
    %112 = tpu.matmul %109, %111, %cst_54 {dimension_numbers = #tpu.dot_dimension_numbers<[1], [0], [0], [1], [0, 0, 1, 1], [], []>} : vector<32x20xf32>, vector<20x32xf32>, vector<32x32xf32> -> vector<32x32xf32>
    %c0_55 = arith.constant 0 : index
    %c0_56 = arith.constant 0 : index
    %c0_57 = arith.constant 0 : index
    %113 = vector.load %arg13[%c0_55, %c0_56, %c0_57] : memref<2x1x32xf32, #tpu.memory_space<vmem>>, vector<1x1x32xf32>
    %114 = vector.shape_cast %113 : vector<1x1x32xf32> to vector<1x32xf32>
    %115 = vector.broadcast %114 : vector<1x32xf32> to vector<32x32xf32>
    %116 = arith.addf %112, %115 : vector<32x32xf32>
    %cst_58 = arith.constant 5.000000e-01 : f32
    %117 = vector.broadcast %cst_58 : f32 to vector<32x32xf32>
    %118 = arith.mulf %117, %116 : vector<32x32xf32>
    %cst_59 = arith.constant 2.000000e+00 : f32
    %119 = math.sqrt %cst_59 : f32
    %cst_60 = arith.constant 1.000000e+00 : f32
    %120 = arith.divf %cst_60, %119 : f32
    %121 = vector.broadcast %120 : f32 to vector<32x32xf32>
    %122 = arith.mulf %116, %121 : vector<32x32xf32>
    %123 = math.erf %122 : vector<32x32xf32>
    %cst_61 = arith.constant 1.000000e+00 : f32
    %124 = vector.broadcast %cst_61 : f32 to vector<32x32xf32>
    %125 = arith.addf %124, %123 : vector<32x32xf32>
    %126 = arith.mulf %118, %125 : vector<32x32xf32>
    %c0_62 = arith.constant 0 : index
    %c0_63 = arith.constant 0 : index
    %c0_64 = arith.constant 0 : index
    %127 = vector.load %arg14[%c0_62, %c0_63, %c0_64] : memref<2x32x20xf32, #tpu.memory_space<vmem>>, vector<1x32x20xf32>
    %128 = vector.shape_cast %127 : vector<1x32x20xf32> to vector<32x20xf32>
    %cst_65 = arith.constant dense<0.000000e+00> : vector<32x20xf32>
    %129 = tpu.matmul %126, %128, %cst_65 {dimension_numbers = #tpu.dot_dimension_numbers<[1], [0], [0], [1], [0, 0, 1, 1], [], []>} : vector<32x32xf32>, vector<32x20xf32>, vector<32x20xf32> -> vector<32x20xf32>
    %130 = arith.addf %83, %129 : vector<32x20xf32>
    %c0_66 = arith.constant 0 : index
    %c0_67 = arith.constant 0 : index
    %c0_68 = arith.constant 0 : index
    %131 = vector.load %arg15[%c0_66, %c0_67, %c0_68] : memref<2x1x20xf32, #tpu.memory_space<vmem>>, vector<1x1x20xf32>
    %132 = vector.shape_cast %131 : vector<1x1x20xf32> to vector<1x20xf32>
    %133 = vector.broadcast %132 : vector<1x20xf32> to vector<32x20xf32>
    %134 = arith.addf %130, %133 : vector<32x20xf32>
    %c1 = arith.constant 1 : index
    %c0_69 = arith.constant 0 : index
    %c0_70 = arith.constant 0 : index
    %135 = vector.load %arg5[%c1, %c0_69, %c0_70] : memref<2x1x20xf32, #tpu.memory_space<vmem>>, vector<1x1x20xf32>
    %136 = vector.shape_cast %135 : vector<1x1x20xf32> to vector<1x20xf32>
    %c1_71 = arith.constant 1 : index
    %c0_72 = arith.constant 0 : index
    %c0_73 = arith.constant 0 : index
    %137 = vector.load %arg6[%c1_71, %c0_72, %c0_73] : memref<2x1x20xf32, #tpu.memory_space<vmem>>, vector<1x1x20xf32>
    %138 = vector.shape_cast %137 : vector<1x1x20xf32> to vector<1x20xf32>
    %cst_74 = arith.constant dense<0.000000e+00> : vector<32xf32>
    %139 = vector.multi_reduction <add>, %134, %cst_74 [1] : vector<32x20xf32> to vector<32xf32>
    %140 = vector.shape_cast %139 : vector<32xf32> to vector<32x1xf32>
    %cst_75 = arith.constant 2.000000e+01 : f32
    %141 = vector.broadcast %cst_75 : f32 to vector<32x1xf32>
    %142 = arith.divf %140, %141 : vector<32x1xf32>
    %143 = arith.mulf %134, %134 : vector<32x20xf32>
    %cst_76 = arith.constant dense<0.000000e+00> : vector<32xf32>
    %144 = vector.multi_reduction <add>, %143, %cst_76 [1] : vector<32x20xf32> to vector<32xf32>
    %145 = vector.shape_cast %144 : vector<32xf32> to vector<32x1xf32>
    %cst_77 = arith.constant 2.000000e+01 : f32
    %146 = vector.broadcast %cst_77 : f32 to vector<32x1xf32>
    %147 = arith.divf %145, %146 : vector<32x1xf32>
    %148 = arith.mulf %142, %142 : vector<32x1xf32>
    %149 = arith.subf %147, %148 : vector<32x1xf32>
    %150 = vector.broadcast %142 : vector<32x1xf32> to vector<32x20xf32>
    %151 = arith.subf %134, %150 : vector<32x20xf32>
    %cst_78 = arith.constant 9.99999974E-6 : f32
    %152 = vector.broadcast %cst_78 : f32 to vector<32x1xf32>
    %153 = arith.addf %149, %152 : vector<32x1xf32>
    %154 = math.rsqrt %153 : vector<32x1xf32>
    %155 = vector.broadcast %154 : vector<32x1xf32> to vector<32x20xf32>
    %156 = arith.mulf %151, %155 : vector<32x20xf32>
    %157 = vector.broadcast %136 : vector<1x20xf32> to vector<32x20xf32>
    %158 = arith.mulf %156, %157 : vector<32x20xf32>
    %159 = vector.broadcast %138 : vector<1x20xf32> to vector<32x20xf32>
    %160 = arith.addf %158, %159 : vector<32x20xf32>
    %c1_79 = arith.constant 1 : index
    %c0_80 = arith.constant 0 : index
    %c0_81 = arith.constant 0 : index
    %161 = vector.load %arg7[%c1_79, %c0_80, %c0_81] : memref<2x20x96xf32, #tpu.memory_space<vmem>>, vector<1x20x96xf32>
    %162 = vector.shape_cast %161 : vector<1x20x96xf32> to vector<20x96xf32>
    %cst_82 = arith.constant dense<0.000000e+00> : vector<32x96xf32>
    %163 = tpu.matmul %160, %162, %cst_82 {dimension_numbers = #tpu.dot_dimension_numbers<[1], [0], [0], [1], [0, 0, 1, 1], [], []>} : vector<32x20xf32>, vector<20x96xf32>, vector<32x96xf32> -> vector<32x96xf32>
    %164 = vector.extract_strided_slice %163 {offsets = [0, 0], sizes = [32, 16], strides = [1, 1]} : vector<32x96xf32> to vector<32x16xf32>
    %165 = vector.extract_strided_slice %163 {offsets = [0, 32], sizes = [32, 16], strides = [1, 1]} : vector<32x96xf32> to vector<32x16xf32>
    %166 = vector.extract_strided_slice %163 {offsets = [0, 64], sizes = [32, 16], strides = [1, 1]} : vector<32x96xf32> to vector<32x16xf32>
    %cst_83 = arith.constant dense<0.000000e+00> : vector<32x32xf32>
    %167 = tpu.matmul %164, %165, %cst_83 {dimension_numbers = #tpu.dot_dimension_numbers<[1], [1], [0], [0], [0, 0, 1, 0], [], []>} : vector<32x16xf32>, vector<32x16xf32>, vector<32x32xf32> -> vector<32x32xf32>
    %168 = arith.addf %167, %13 : vector<32x32xf32>
    %cst_84 = arith.constant dense<0xFF800000> : vector<32xf32>
    %169 = vector.multi_reduction <maximumf>, %168, %cst_84 [1] : vector<32x32xf32> to vector<32xf32>
    %170 = vector.shape_cast %169 : vector<32xf32> to vector<32x1xf32>
    %171 = vector.broadcast %170 : vector<32x1xf32> to vector<32x32xf32>
    %172 = arith.subf %168, %171 : vector<32x32xf32>
    %173 = math.exp %172 : vector<32x32xf32>
    %cst_85 = arith.constant dense<0.000000e+00> : vector<32xf32>
    %174 = vector.multi_reduction <add>, %173, %cst_85 [1] : vector<32x32xf32> to vector<32xf32>
    %175 = vector.shape_cast %174 : vector<32xf32> to vector<32x1xf32>
    %176 = tpu.reciprocal %175 {approx = true} : vector<32x1xf32> -> vector<32x1xf32>
    %177 = vector.broadcast %176 : vector<32x1xf32> to vector<32x32xf32>
    %178 = arith.mulf %173, %177 : vector<32x32xf32>
    %cst_86 = arith.constant dense<0.000000e+00> : vector<32x16xf32>
    %179 = tpu.matmul %178, %166, %cst_86 {dimension_numbers = #tpu.dot_dimension_numbers<[1], [0], [0], [1], [0, 0, 1, 1], [], []>} : vector<32x32xf32>, vector<32x16xf32>, vector<32x16xf32> -> vector<32x16xf32>
    %180 = vector.extract_strided_slice %163 {offsets = [0, 16], sizes = [32, 16], strides = [1, 1]} : vector<32x96xf32> to vector<32x16xf32>
    %181 = vector.extract_strided_slice %163 {offsets = [0, 48], sizes = [32, 16], strides = [1, 1]} : vector<32x96xf32> to vector<32x16xf32>
    %182 = vector.extract_strided_slice %163 {offsets = [0, 80], sizes = [32, 16], strides = [1, 1]} : vector<32x96xf32> to vector<32x16xf32>
    %cst_87 = arith.constant dense<0.000000e+00> : vector<32x32xf32>
    %183 = tpu.matmul %180, %181, %cst_87 {dimension_numbers = #tpu.dot_dimension_numbers<[1], [1], [0], [0], [0, 0, 1, 0], [], []>} : vector<32x16xf32>, vector<32x16xf32>, vector<32x32xf32> -> vector<32x32xf32>
    %184 = arith.addf %183, %13 : vector<32x32xf32>
    %cst_88 = arith.constant dense<0xFF800000> : vector<32xf32>
    %185 = vector.multi_reduction <maximumf>, %184, %cst_88 [1] : vector<32x32xf32> to vector<32xf32>
    %186 = vector.shape_cast %185 : vector<32xf32> to vector<32x1xf32>
    %187 = vector.broadcast %186 : vector<32x1xf32> to vector<32x32xf32>
    %188 = arith.subf %184, %187 : vector<32x32xf32>
    %189 = math.exp %188 : vector<32x32xf32>
    %cst_89 = arith.constant dense<0.000000e+00> : vector<32xf32>
    %190 = vector.multi_reduction <add>, %189, %cst_89 [1] : vector<32x32xf32> to vector<32xf32>
    %191 = vector.shape_cast %190 : vector<32xf32> to vector<32x1xf32>
    %192 = tpu.reciprocal %191 {approx = true} : vector<32x1xf32> -> vector<32x1xf32>
    %193 = vector.broadcast %192 : vector<32x1xf32> to vector<32x32xf32>
    %194 = arith.mulf %189, %193 : vector<32x32xf32>
    %cst_90 = arith.constant dense<0.000000e+00> : vector<32x16xf32>
    %195 = tpu.matmul %194, %182, %cst_90 {dimension_numbers = #tpu.dot_dimension_numbers<[1], [0], [0], [1], [0, 0, 1, 1], [], []>} : vector<32x32xf32>, vector<32x16xf32>, vector<32x16xf32> -> vector<32x16xf32>
    %196 = tpu.concatenate %179, %195 in 1 : vector<32x16xf32>, vector<32x16xf32> -> vector<32x32xf32>
    %c1_91 = arith.constant 1 : index
    %c0_92 = arith.constant 0 : index
    %c0_93 = arith.constant 0 : index
    %197 = vector.load %arg8[%c1_91, %c0_92, %c0_93] : memref<2x32x20xf32, #tpu.memory_space<vmem>>, vector<1x32x20xf32>
    %198 = vector.shape_cast %197 : vector<1x32x20xf32> to vector<32x20xf32>
    %cst_94 = arith.constant dense<0.000000e+00> : vector<32x20xf32>
    %199 = tpu.matmul %196, %198, %cst_94 {dimension_numbers = #tpu.dot_dimension_numbers<[1], [0], [0], [1], [0, 0, 1, 1], [], []>} : vector<32x32xf32>, vector<32x20xf32>, vector<32x20xf32> -> vector<32x20xf32>
    %200 = arith.addf %134, %199 : vector<32x20xf32>
    %c1_95 = arith.constant 1 : index
    %c0_96 = arith.constant 0 : index
    %c0_97 = arith.constant 0 : index
    %201 = vector.load %arg9[%c1_95, %c0_96, %c0_97] : memref<2x1x20xf32, #tpu.memory_space<vmem>>, vector<1x1x20xf32>
    %202 = vector.shape_cast %201 : vector<1x1x20xf32> to vector<1x20xf32>
    %203 = vector.broadcast %202 : vector<1x20xf32> to vector<32x20xf32>
    %204 = arith.addf %200, %203 : vector<32x20xf32>
    %c1_98 = arith.constant 1 : index
    %c0_99 = arith.constant 0 : index
    %c0_100 = arith.constant 0 : index
    %205 = vector.load %arg10[%c1_98, %c0_99, %c0_100] : memref<2x1x20xf32, #tpu.memory_space<vmem>>, vector<1x1x20xf32>
    %206 = vector.shape_cast %205 : vector<1x1x20xf32> to vector<1x20xf32>
    %c1_101 = arith.constant 1 : index
    %c0_102 = arith.constant 0 : index
    %c0_103 = arith.constant 0 : index
    %207 = vector.load %arg11[%c1_101, %c0_102, %c0_103] : memref<2x1x20xf32, #tpu.memory_space<vmem>>, vector<1x1x20xf32>
    %208 = vector.shape_cast %207 : vector<1x1x20xf32> to vector<1x20xf32>
    %cst_104 = arith.constant dense<0.000000e+00> : vector<32xf32>
    %209 = vector.multi_reduction <add>, %204, %cst_104 [1] : vector<32x20xf32> to vector<32xf32>
    %210 = vector.shape_cast %209 : vector<32xf32> to vector<32x1xf32>
    %cst_105 = arith.constant 2.000000e+01 : f32
    %211 = vector.broadcast %cst_105 : f32 to vector<32x1xf32>
    %212 = arith.divf %210, %211 : vector<32x1xf32>
    %213 = arith.mulf %204, %204 : vector<32x20xf32>
    %cst_106 = arith.constant dense<0.000000e+00> : vector<32xf32>
    %214 = vector.multi_reduction <add>, %213, %cst_106 [1] : vector<32x20xf32> to vector<32xf32>
    %215 = vector.shape_cast %214 : vector<32xf32> to vector<32x1xf32>
    %cst_107 = arith.constant 2.000000e+01 : f32
    %216 = vector.broadcast %cst_107 : f32 to vector<32x1xf32>
    %217 = arith.divf %215, %216 : vector<32x1xf32>
    %218 = arith.mulf %212, %212 : vector<32x1xf32>
    %219 = arith.subf %217, %218 : vector<32x1xf32>
    %220 = vector.broadcast %212 : vector<32x1xf32> to vector<32x20xf32>
    %221 = arith.subf %204, %220 : vector<32x20xf32>
    %cst_108 = arith.constant 9.99999974E-6 : f32
    %222 = vector.broadcast %cst_108 : f32 to vector<32x1xf32>
    %223 = arith.addf %219, %222 : vector<32x1xf32>
    %224 = math.rsqrt %223 : vector<32x1xf32>
    %225 = vector.broadcast %224 : vector<32x1xf32> to vector<32x20xf32>
    %226 = arith.mulf %221, %225 : vector<32x20xf32>
    %227 = vector.broadcast %206 : vector<1x20xf32> to vector<32x20xf32>
    %228 = arith.mulf %226, %227 : vector<32x20xf32>
    %229 = vector.broadcast %208 : vector<1x20xf32> to vector<32x20xf32>
    %230 = arith.addf %228, %229 : vector<32x20xf32>
    %c1_109 = arith.constant 1 : index
    %c0_110 = arith.constant 0 : index
    %c0_111 = arith.constant 0 : index
    %231 = vector.load %arg12[%c1_109, %c0_110, %c0_111] : memref<2x20x32xf32, #tpu.memory_space<vmem>>, vector<1x20x32xf32>
    %232 = vector.shape_cast %231 : vector<1x20x32xf32> to vector<20x32xf32>
    %cst_112 = arith.constant dense<0.000000e+00> : vector<32x32xf32>
    %233 = tpu.matmul %230, %232, %cst_112 {dimension_numbers = #tpu.dot_dimension_numbers<[1], [0], [0], [1], [0, 0, 1, 1], [], []>} : vector<32x20xf32>, vector<20x32xf32>, vector<32x32xf32> -> vector<32x32xf32>
    %c1_113 = arith.constant 1 : index
    %c0_114 = arith.constant 0 : index
    %c0_115 = arith.constant 0 : index
    %234 = vector.load %arg13[%c1_113, %c0_114, %c0_115] : memref<2x1x32xf32, #tpu.memory_space<vmem>>, vector<1x1x32xf32>
    %235 = vector.shape_cast %234 : vector<1x1x32xf32> to vector<1x32xf32>
    %236 = vector.broadcast %235 : vector<1x32xf32> to vector<32x32xf32>
    %237 = arith.addf %233, %236 : vector<32x32xf32>
    %cst_116 = arith.constant 5.000000e-01 : f32
    %238 = vector.broadcast %cst_116 : f32 to vector<32x32xf32>
    %239 = arith.mulf %238, %237 : vector<32x32xf32>
    %cst_117 = arith.constant 2.000000e+00 : f32
    %240 = math.sqrt %cst_117 : f32
    %cst_118 = arith.constant 1.000000e+00 : f32
    %241 = arith.divf %cst_118, %240 : f32
    %242 = vector.broadcast %241 : f32 to vector<32x32xf32>
    %243 = arith.mulf %237, %242 : vector<32x32xf32>
    %244 = math.erf %243 : vector<32x32xf32>
    %cst_119 = arith.constant 1.000000e+00 : f32
    %245 = vector.broadcast %cst_119 : f32 to vector<32x32xf32>
    %246 = arith.addf %245, %244 : vector<32x32xf32>
    %247 = arith.mulf %239, %246 : vector<32x32xf32>
    %c1_120 = arith.constant 1 : index
    %c0_121 = arith.constant 0 : index
    %c0_122 = arith.constant 0 : index
    %248 = vector.load %arg14[%c1_120, %c0_121, %c0_122] : memref<2x32x20xf32, #tpu.memory_space<vmem>>, vector<1x32x20xf32>
    %249 = vector.shape_cast %248 : vector<1x32x20xf32> to vector<32x20xf32>
    %cst_123 = arith.constant dense<0.000000e+00> : vector<32x20xf32>
    %250 = tpu.matmul %247, %249, %cst_123 {dimension_numbers = #tpu.dot_dimension_numbers<[1], [0], [0], [1], [0, 0, 1, 1], [], []>} : vector<32x32xf32>, vector<32x20xf32>, vector<32x20xf32> -> vector<32x20xf32>
    %251 = arith.addf %204, %250 : vector<32x20xf32>
    %c1_124 = arith.constant 1 : index
    %c0_125 = arith.constant 0 : index
    %c0_126 = arith.constant 0 : index
    %252 = vector.load %arg15[%c1_124, %c0_125, %c0_126] : memref<2x1x20xf32, #tpu.memory_space<vmem>>, vector<1x1x20xf32>
    %253 = vector.shape_cast %252 : vector<1x1x20xf32> to vector<1x20xf32>
    %254 = vector.broadcast %253 : vector<1x20xf32> to vector<32x20xf32>
    %255 = arith.addf %251, %254 : vector<32x20xf32>
    %256 = vector.extract_strided_slice %255 {offsets = [0, 0], sizes = [1, 20], strides = [1, 1]} : vector<32x20xf32> to vector<1x20xf32>
    %257 = vector.extract_strided_slice %255 {offsets = [16, 0], sizes = [1, 20], strides = [1, 1]} : vector<32x20xf32> to vector<1x20xf32>
    %258 = tpu.concatenate %256, %257 in 0 : vector<1x20xf32>, vector<1x20xf32> -> vector<2x20xf32>
    %c0_127 = arith.constant 0 : index
    %c0_128 = arith.constant 0 : index
    %259 = vector.load %arg16[%c0_127, %c0_128] : memref<1x20xf32, #tpu.memory_space<vmem>>, vector<1x20xf32>
    %c0_129 = arith.constant 0 : index
    %c0_130 = arith.constant 0 : index
    %260 = vector.load %arg17[%c0_129, %c0_130] : memref<1x20xf32, #tpu.memory_space<vmem>>, vector<1x20xf32>
    %cst_131 = arith.constant dense<0.000000e+00> : vector<2xf32>
    %261 = vector.multi_reduction <add>, %258, %cst_131 [1] : vector<2x20xf32> to vector<2xf32>
    %262 = vector.shape_cast %261 : vector<2xf32> to vector<2x1xf32>
    %cst_132 = arith.constant 2.000000e+01 : f32
    %263 = vector.broadcast %cst_132 : f32 to vector<2x1xf32>
    %264 = arith.divf %262, %263 : vector<2x1xf32>
    %265 = arith.mulf %258, %258 : vector<2x20xf32>
    %cst_133 = arith.constant dense<0.000000e+00> : vector<2xf32>
    %266 = vector.multi_reduction <add>, %265, %cst_133 [1] : vector<2x20xf32> to vector<2xf32>
    %267 = vector.shape_cast %266 : vector<2xf32> to vector<2x1xf32>
    %cst_134 = arith.constant 2.000000e+01 : f32
    %268 = vector.broadcast %cst_134 : f32 to vector<2x1xf32>
    %269 = arith.divf %267, %268 : vector<2x1xf32>
    %270 = arith.mulf %264, %264 : vector<2x1xf32>
    %271 = arith.subf %269, %270 : vector<2x1xf32>
    %272 = vector.broadcast %264 : vector<2x1xf32> to vector<2x20xf32>
    %273 = arith.subf %258, %272 : vector<2x20xf32>
    %cst_135 = arith.constant 9.99999974E-6 : f32
    %274 = vector.broadcast %cst_135 : f32 to vector<2x1xf32>
    %275 = arith.addf %271, %274 : vector<2x1xf32>
    %276 = math.rsqrt %275 : vector<2x1xf32>
    %277 = vector.broadcast %276 : vector<2x1xf32> to vector<2x20xf32>
    %278 = arith.mulf %273, %277 : vector<2x20xf32>
    %279 = vector.broadcast %259 : vector<1x20xf32> to vector<2x20xf32>
    %280 = arith.mulf %278, %279 : vector<2x20xf32>
    %281 = vector.broadcast %260 : vector<1x20xf32> to vector<2x20xf32>
    %282 = arith.addf %280, %281 : vector<2x20xf32>
    %c0_136 = arith.constant 0 : index
    %c0_137 = arith.constant 0 : index
    %283 = vector.load %arg18[%c0_136, %c0_137] : memref<20x5xf32, #tpu.memory_space<vmem>>, vector<20x5xf32>
    %cst_138 = arith.constant dense<0.000000e+00> : vector<2x5xf32>
    %284 = tpu.matmul %282, %283, %cst_138 {dimension_numbers = #tpu.dot_dimension_numbers<[1], [0], [0], [1], [0, 0, 1, 1], [], []>} : vector<2x20xf32>, vector<20x5xf32>, vector<2x5xf32> -> vector<2x5xf32>
    %c0_139 = arith.constant 0 : index
    %c0_140 = arith.constant 0 : index
    %285 = vector.load %arg19[%c0_139, %c0_140] : memref<1x5xf32, #tpu.memory_space<vmem>>, vector<1x5xf32>
    %286 = vector.broadcast %285 : vector<1x5xf32> to vector<2x5xf32>
    %287 = arith.addf %284, %286 : vector<2x5xf32>
    %c0_141 = arith.constant 0 : index
    %c0_142 = arith.constant 0 : index
    %288 = vector.load %arg20[%c0_141, %c0_142] : memref<2x5xf32, #tpu.memory_space<vmem>>, vector<2x5xf32>
    tpu.vector_store %arg20[%c0_141, %c0_142], %287 {strides = array<i32>} : memref<2x5xf32, #tpu.memory_space<vmem>>, vector<2x5xf32>,
    return
  }
}

</mosaic_0001>

<bundles_post_ra>
// kernel: vit2_forward.1
= control target key start
LH: loop header
LB: loop body
LE: loop exit
PB: predicated region body
PF: predicated region fallthrough
CT: control target
= control target key end

     0   :  { %s4211_s0 = inlined_call_operand.vmem [shape: f32[64,19], index: 0, kind: input, shape index: {}]   ;;  %s4212_s1 = inlined_call_operand.vmem [shape: f32[19,20], index: 1, kind: input, shape index: {}]   ;;  %s4213_s2 = inlined_call_operand.vmem [shape: f32[1,20], index: 2, kind: input, shape index: {}]   ;;  %s4214_s3 = inlined_call_operand.vmem [shape: f32[32,20], index: 3, kind: input, shape index: {}]   ;;  %s4215_s4 = inlined_call_operand.vmem [shape: f32[32,32], index: 4, kind: input, shape index: {}]   ;;  %s4216_s5 = inlined_call_operand.vmem [shape: f32[2,1,20], index: 5, kind: input, shape index: {}]   ;;  %s4217_s6 = inlined_call_operand.vmem [shape: f32[2,1,20], index: 6, kind: input, shape index: {}]   ;;  %s4218_s7 = inlined_call_operand.vmem [shape: f32[2,20,96], index: 7, kind: input, shape index: {}]   ;;  %s4219_s8 = inlined_call_operand.vmem [shape: f32[2,32,20], index: 8, kind: input, shape index: {}]   ;;  %s4220_s9 = inlined_call_operand.vmem [shape: f32[2,1,20], index: 9, kind: input, shape index: {}]   ;;  %s4221_s10 = inlined_call_operand.vmem [shape: f32[2,1,20], index: 10, kind: input, shape index: {}]   ;;  %s4222_s11 = inlined_call_operand.vmem [shape: f32[2,1,20], index: 11, kind: input, shape index: {}]   ;;  %s4223_s12 = inlined_call_operand.vmem [shape: f32[2,20,32], index: 12, kind: input, shape index: {}]   ;;  %s4224_s13 = inlined_call_operand.vmem [shape: f32[2,1,32], index: 13, kind: input, shape index: {}]   ;;  %s4225_s14 = inlined_call_operand.vmem [shape: f32[2,32,20], index: 14, kind: input, shape index: {}]   ;;  %s4226_s15 = inlined_call_operand.vmem [shape: f32[2,1,20], index: 15, kind: input, shape index: {}]   ;;  %s4227_s16 = inlined_call_operand.vmem [shape: f32[1,20], index: 16, kind: input, shape index: {}]   ;;  %s4228_s17 = inlined_call_operand.vmem [shape: f32[1,20], index: 17, kind: input, shape index: {}]   ;;  %s4229_s18 = inlined_call_operand.vmem [shape: f32[20,5], index: 18, kind: input, shape index: {}]   ;;  %s4230_s19 = inlined_call_operand.vmem [shape: f32[1,5], index: 19, kind: input, shape index: {}]   ;;  %s4231_s20 = inlined_call_operand.hbm [shape: f32[2,5], index: 20, kind: output, shape index: {}]  }
   0x1   :  { %4236 = sst [smem:[#allocation5_spill]] %s4211_s0 }
   0x2   :  { %4237 = sst [smem:[#allocation6_spill]] %s4212_s1 }
   0x3   :  { %4238 = sst [smem:[#allocation7_spill]] %s4213_s2 }
   0x4   :  { %4239 = sst [smem:[#allocation8_spill]] %s4214_s3 }
   0x5   :  { %4240 = sst [smem:[#allocation9_spill]] %s4215_s4 }
   0x6   :  { %s4241_s23 = sld [smem:[#allocation6_spill]]  ;;  %vm109_vm0 = vcmask 1042432   ;;  %vm84_vm1 = vcmask 154624  }
   0x7   :  { %s4242_s26 = sld [smem:[#allocation5_spill]] }
   0xc   :  { %v76_v0 = vld [vmem:[%s4241_s23 + $0x10] sm:$0x7]  ;;  %v75_v1 = vld [vmem:[%s4241_s23 + $0x8] sm:$0xff]  ;;  %v74_v3 = vld [vmem:[%s4241_s23] sm:$0xff] }
   0xd   :  { %3034 = vmatprep.subr.msk.mxu0 %vm109_vm0, %v76_v0  ;;  %v66_v2 = vld [vmem:[%s4242_s26] sm:$0xff] }
   0xe   :  { %3035 = vmatpush3.msk.msra.mxu0 %vm109_vm0, %v76_v0  ;;  %3040 = vmatprep.mubr.msk.f32.mxu0 %vm84_vm1, %v66_v2 }
   0xf   :  { %3036 = vmatprep.subr.mxu0 %v75_v1 }
  0x10   :  { %25 = vsyncpa [#allocation3], 0  ;;  %3037 = vmatpush3.msra.mxu0 %v75_v1  ;;  %v67_v4 = vld [vmem:[%s4242_s26 + $0x8] sm:$0xff]  ;;  %v68_v5 = vld [vmem:[%s4242_s26 + $0x10] sm:$0xff]  ;;  %s4243_s30 = sld [smem:[#allocation7_spill]]  ;;  %vm244_vm2 = vcmask 162816  }
  0x11   :  { %3038 = vmatprep.subr.mxu0 %v74_v3  ;;  %v69_v6 = vld [vmem:[%s4242_s26 + $0x18] sm:$0xff]  ;;  %v70_v7 = vld [vmem:[%s4242_s26 + $0x20] sm:$0xff]  ;;  %v71_v8 = vld [vmem:[%s4242_s26 + $0x28] sm:$0xff]  ;;  %s4244_s21 = sld [smem:[#allocation8_spill]]  ;;  %vm341_vm3 = vcmask 1043456   ;;  %vm442_vm4 = vcmask 130048  }
  0x12   :  { %3039 = vmatpush3.msra.mxu0 %v74_v3  ;;  %v72_v9 = vld [vmem:[%s4242_s26 + $0x30] sm:$0xff]  ;;  %v73_v10 = vld [vmem:[%s4242_s26 + $0x38] sm:$0xff]  ;;  %v327_v61 = vld [vmem:[%s4218_s7 + $0x8] sm:$0xff]  ;;  %s3426_s22 = smov 96   ;;  %s4245_s2 = sld [smem:[#allocation9_spill]]  ;;  %vm544_vm5 = vcmask 261120  }
  0x13   :  { %3041 = vmatmul.mubr.msk.f32.vlgmr.msra.gmra.mxu0 %vm84_vm1, %v67_v4  ;;  %v328_v60 = vld [vmem:[%s4218_s7 + $0x10] sm:$0xf]  ;;  %v326_v62 = vld [vmem:[%s4218_s7] sm:$0xff]  ;;  %s3428_s26 = smov 80   ;;  %s3429_s0 = smov 112   ;;  %vm2625_vm6 = vcmask 1040384  }
  0x14   :  { %3043 = vmatprep.mubr.msk.f32.mxu0 %vm84_vm1, %v68_v5  ;;  %3052 = vmatprep.subr.msk.mxu1 %vm341_vm3, %v328_v60  ;;  %s3431_s29 = smov 16   ;;  %vm2629_vm7 = vcmask 156672   ;;  %vm3433_vm8 = vmmov 0   ;;  %vm2745_vm9 = vcmask 33792  }
  0x15   :  { %3053 = vmatpush3.msk.msra.mxu1 %vm341_vm3, %v328_v60 }
  0x16   :  { %v2761_v13 = vld [vmem:[%s4243_s30] ss:$0 sm:$0xff]  ;;  %3054 = vmatprep.subr.mxu1 %v327_v61  ;;  %s3427_s30 = smov 64  }
  0x17   :  { %3044 = vmatmul.mubr.msk.f32.gmra.mxu0 %vm84_vm1, %v69_v6  ;;  %v231_v25 = vld [vmem:[%s4244_s21 + $0x8] sm:$0xff]  ;;  %v230_v32 = vld [vmem:[%s4244_s21] sm:$0xff]  ;;  %v232_v43 = vld [vmem:[%s4244_s21 + $0x10] sm:$0xff]  ;;  %3055 = vmatpush3.msra.mxu1 %v327_v61 }
  0x18   :  { %3046 = vmatprep.mubr.msk.f32.mxu0 %vm84_vm1, %v70_v7  ;;  %v233_v49 = vld [vmem:[%s4244_s21 + $0x18] sm:$0xff]  ;;  %3056 = vmatprep.subr.mxu1 %v326_v62  ;;  %v3684_v61 = vld [vmem:[%s4245_s2 + $0x8] sm:$0xff]  ;;  %s3430_s21 = smov 48  }
  0x19   :  { %3057 = vmatpush3.msra.mxu1 %v326_v62 }
  0x1b   :  { %3047 = vmatmul.mubr.msk.f32.gmra.mxu0 %vm84_vm1, %v71_v8 }
  0x1c   :  { %3049 = vmatprep.mubr.msk.f32.mxu0 %vm84_vm1, %v72_v9 }
  0x1f   :  { %3050 = vmatmul.mubr.msk.f32.gmra.mxu0 %vm84_vm1, %v73_v10 }
  0xd3   :  { %v3042_v11 = vpop.f32.mrf.mxu0 }
  0xd4   :  { %v185_v16 = vadd.f32 %v3042_v11, %v2761_v13 }
  0xd5   :  { %v179_v12 = vpop.f32.mrf.mxu0 }
  0xd6   :  { %v180_v17 = vadd.f32 %v2761_v13, %v179_v12  ;;  %v219_v21 = vmax.f32 %v185_v16, 0.0 }
  0xd7   :  { %v3045_v14 = vpop.f32.mrf.mxu0 }
  0xd8   :  { %v218_v24 = vmax.f32 %v180_v17, 0.0  ;;  %v195_v31 = vadd.f32 %v3045_v14, %v2761_v13 }
  0xd9   :  { %v189_v15 = vpop.f32.mrf.mxu0 }
  0xda   :  { %v190_v27 = vadd.f32 %v2761_v13, %v189_v15  ;;  %v221_v42 = vmax.f32 %v195_v31, 0.0  ;;  %v2771_v31 = vld [vmem:[%s4216_s5] ss:$0 sm:$0xff] }
  0xdb   :  { %v3048_v18 = vpop.f32.mrf.mxu0 }
  0xdc   :  { %v205_v19 = vadd.f32 %v3048_v18, %v2761_v13  ;;  %v220_v38 = vmax.f32 %v190_v27, 0.0 }
  0xdd   :  { %v199_v20 = vpop.f32.mrf.mxu0 }
  0xde   :  { %v223_v22 = vmax.f32 %v205_v19, 0.0  ;;  %v200_v23 = vadd.f32 %v2761_v13, %v199_v20 }
  0xdf   :  { %v3051_v26 = vpop.f32.mrf.mxu0 }
  0xe0   :  { %v227_v28 = vmax.f32 %v219_v21, %v223_v22  ;;  %v222_v29 = vmax.f32 %v200_v23, 0.0  ;;  %v215_v30 = vadd.f32 %v3051_v26, %v2761_v13 }
  0xe1   :  { %v209_v33 = vpop.f32.mrf.mxu0 }
  0xe2   :  { %v3590_v34 = vadd.f32 %v231_v25, %v227_v28  ;;  %v226_v35 = vmax.f32 %v218_v24, %v222_v29  ;;  %v210_v36 = vadd.f32 %v2761_v13, %v209_v33  ;;  %v225_v37 = vmax.f32 %v215_v30, 0.0 }
  0xe4   :  { %v3592_v39 = vadd.f32 %v230_v32, %v226_v35  ;;  %v224_v40 = vmax.f32 %v210_v36, 0.0  ;;  %v248_v41 = vsel %vm244_vm2, %v3590_v34, 0.0  ;;  %v263_v44 = vmul.f32 %v3590_v34, %v3590_v34  ;;  %v2772_v36 = vld [vmem:[%s4217_s6] ss:$0 sm:$0xff] }
  0xe5   :  { %249 = vadd.xlane.f32.xlu0 %v248_v41  ;;  %v229_v46 = vmax.f32 %v221_v42, %v225_v37 }
  0xe6   :  { %v228_v45 = vmax.f32 %v220_v38, %v224_v40  ;;  %v269_v47 = vsel %vm244_vm2, %v263_v44, 0.0  ;;  %v262_v48 = vmul.f32 %v3592_v39, %v3592_v39  ;;  %v245_v51 = vsel %vm244_vm2, %v3592_v39, 0.0 }
  0xe7   :  { %270 = vadd.xlane.f32.xlu1 %v269_v47  ;;  %v3611_v52 = vadd.f32 %v233_v49, %v229_v46 }
  0xe8   :  { %v3607_v50 = vadd.f32 %v232_v43, %v228_v45  ;;  %v266_v53 = vsel %vm244_vm2, %v262_v48, 0.0 }
  0xe9   :  { %246 = vadd.xlane.f32.xlu0 %v245_v51  ;;  %v254_v56 = vsel %vm244_vm2, %v3611_v52, 0.0  ;;  %v265_v57 = vmul.f32 %v3611_v52, %v3611_v52 }
  0xea   :  { %v251_v54 = vsel %vm244_vm2, %v3607_v50, 0.0  ;;  %v264_v55 = vmul.f32 %v3607_v50, %v3607_v50 }
  0xeb   :  { %267 = vadd.xlane.f32.xlu1 %v266_v53  ;;  %v275_v59 = vsel %vm244_vm2, %v265_v57, 0.0 }
  0xec   :  { %v272_v58 = vsel %vm244_vm2, %v264_v55, 0.0 }
  0xed   :  { %252 = vadd.xlane.f32.xlu0 %v251_v54 }
  0xef   :  { %255 = vadd.xlane.f32.xlu1 %v254_v56 }
  0xf1   :  { %273 = vadd.xlane.f32.xlu0 %v272_v58 }
  0xf3   :  { %276 = vadd.xlane.f32.xlu1 %v275_v59 }
 0x16e   :  { %v250_v63 = vpop.xlane.xlu0 %249 }
 0x16f   :  { %v259_v0 = vmul.f32 0.05, %v250_v63  ;;  %v3689_v63 = vld [vmem:[%s4245_s2] sm:$0xff] }
 0x170   :  { %v271_v2 = vpop.xlane.xlu1 %270 }
 0x171   :  { %v283_v1 = vmul.f32 %v259_v0, %v259_v0  ;;  %v279_v3 = vmul.f32 0.05, %v271_v2  ;;  %v291_v28 = vsub.f32 %v3590_v34, %v259_v0  ;;  %v3695_v2 = vld [vmem:[%s4245_s2 + $0x18] sm:$0xff] }
 0x172   :  { %v247_v4 = vpop.xlane.xlu0 %246 }
 0x173   :  { %v258_v5 = vmul.f32 0.05, %v247_v4  ;;  %v287_v6 = vsub.f32 %v279_v3, %v283_v1 }
 0x174   :  { %v268_v8 = vpop.xlane.xlu1 %267 }
 0x175   :  { %v282_v7 = vmul.f32 %v258_v5, %v258_v5  ;;  %v295_v9 = vadd.f32 1e-05, %v287_v6  ;;  %v278_v10 = vmul.f32 0.05, %v268_v8  ;;  %v290_v30 = vsub.f32 %v3592_v39, %v258_v5 }
 0x176   :  { %v253_v11 = vpop.xlane.xlu0 %252 }
 0x177   :  { %v260_v12 = vmul.f32 0.05, %v253_v11  ;;  %3286 = vrsqrt.f32 %v295_v9  ;;  %v286_v13 = vsub.f32 %v278_v10, %v282_v7  ;;  %v3704_v9 = vld [vmem:[%s4245_s2 + $0x10] sm:$0xff] }
 0x178   :  { %v256_v14 = vpop.xlane.xlu1 %255 }
 0x179   :  { %v294_v15 = vadd.f32 1e-05, %v286_v13  ;;  %v261_v16 = vmul.f32 0.05, %v256_v14  ;;  %v284_v18 = vmul.f32 %v260_v12, %v260_v12  ;;  %v292_v38 = vsub.f32 %v3607_v50, %v260_v12 }
 0x17a   :  { %v274_v17 = vpop.xlane.xlu0 %273 }
 0x17b   :  { %v280_v19 = vmul.f32 0.05, %v274_v17  ;;  %3288 = vrsqrt.f32 %v294_v15  ;;  %v285_v22 = vmul.f32 %v261_v16, %v261_v16  ;;  %v293_v44 = vsub.f32 %v3611_v52, %v261_v16 }
 0x17c   :  { %v277_v21 = vpop.xlane.xlu1 %276 }
 0x17d   :  { %v288_v20 = vsub.f32 %v280_v19, %v284_v18  ;;  %v281_v23 = vmul.f32 0.05, %v277_v21 }
 0x17f   :  { %v296_v24 = vadd.f32 1e-05, %v288_v20  ;;  %v289_v25 = vsub.f32 %v281_v23, %v285_v22 }
 0x181   :  { %3290 = vrsqrt.f32 %v296_v24  ;;  %v297_v26 = vadd.f32 1e-05, %v289_v25 }
 0x183   :  { %3292 = vrsqrt.f32 %v297_v26 }
 0x184   :  { %v3287_v27 = vpop.eup %3286 }
 0x185   :  { %v303_v29 = vmul.f32 %v3287_v27, %v291_v28 }
 0x187   :  { %v313_v35 = vmul.f32 %v2771_v31, %v303_v29 }
 0x188   :  { %v3289_v32 = vpop.eup %3288 }
 0x189   :  { %v302_v33 = vmul.f32 %v3289_v32, %v290_v30  ;;  %v323_v42 = vadd.f32 %v2772_v36, %v313_v35 }
 0x18b   :  { %v312_v37 = vmul.f32 %v2771_v31, %v302_v33 }
 0x18d   :  { %v322_v41 = vadd.f32 %v2772_v36, %v312_v37 }
 0x18e   :  { %v3291_v40 = vpop.eup %3290 }
 0x18f   :  { %v304_v43 = vmul.f32 %v3291_v40, %v292_v38  ;;  %3058 = vmatprep.mubr.msk.f32.mxu1 %vm244_vm2, %v322_v41 }
 0x190   :  { %v3293_v45 = vpop.eup %3292  ;;  %3059 = vmatmul.mubr.msk.f32.vlgmr.msra.gmra.mxu1 %vm244_vm2, %v323_v42 }
 0x191   :  { %v314_v46 = vmul.f32 %v2771_v31, %v304_v43  ;;  %v305_v47 = vmul.f32 %v3293_v45, %v293_v44 }
 0x193   :  { %v324_v48 = vadd.f32 %v2772_v36, %v314_v46  ;;  %v315_v49 = vmul.f32 %v2771_v31, %v305_v47 }
 0x195   :  { %3061 = vmatprep.mubr.msk.f32.mxu1 %vm244_vm2, %v324_v48  ;;  %v325_v51 = vadd.f32 %v2772_v36, %v315_v49 }
 0x197   :  { %3062 = vmatmul.mubr.msk.f32.gmra.mxu1 %vm244_vm2, %v325_v51 }
 0x250   :  { %v3649_v53 = vpop.f32.mrf.mxu1 }
 0x252   :  { %v3651_v54 = vpop.f32.mrf.mxu1 }
 0x253   :  { %3072 = vmatprep.mubr.msk.f32.mxu0 %vm442_vm4, %v3651_v54 }
 0x257   :  { %v3655_v55 = vpop.f32.mrf.mxu1 }
 0x258   :  { %440 = vrot.lane.b32.xlu0 %v3655_v55, %s3426_s22 }
 0x259   :  { %v3659_v56 = vpop.f32.mrf.mxu1 }
 0x25a   :  { %438 = vrot.lane.b32.xlu1 %v3659_v56, %s3426_s22 }
 0x25e   :  { %436 = vrot.lane.b32.xlu1 %v3649_v53, %s3426_s22 }
 0x262   :  { %434 = vrot.lane.b32.xlu1 %v3651_v54, %s3426_s22 }
 0x2ca   :  { %v441_v57 = vpop.permute.xlu0 %440 }
 0x2cb   :  { %3064 = vmatprep.subr.msk.mxu0 %vm442_vm4, %v441_v57 }
 0x2cc   :  { %3065 = vmatpush3.xpose.msk.msra.mxu0 %vm442_vm4, %v441_v57  ;;  %v439_v58 = vpop.permute.xlu1 %438 }
 0x2cd   :  { %3066 = vmatprep.subr.msk.mxu0 %vm442_vm4, %v439_v58 }
 0x2d0   :  { %3067 = vmatpush3.xpose.msk.msra.mxu0 %vm442_vm4, %v439_v58  ;;  %v437_v59 = vpop.permute.xlu1 %436 }
 0x2d1   :  { %3068 = vmatprep.subr.msk.mxu0 %vm442_vm4, %v437_v59 }
 0x2d4   :  { %3069 = vmatpush3.xpose.msk.msra.mxu0 %vm442_vm4, %v437_v59  ;;  %v435_v60 = vpop.permute.xlu1 %434 }
 0x2d5   :  { %3070 = vmatprep.subr.msk.mxu0 %vm442_vm4, %v435_v60 }
 0x2d8   :  { %3071 = vmatpush3.xpose.msk.msra.mxu0 %vm442_vm4, %v435_v60 }
 0x2db   :  { %3073 = vmatmul.mubr.msk.f32.vlgmr.msra.gmra.mxu0 %vm442_vm4, %v3649_v53 }
 0x2dc   :  { %3075 = vmatprep.mubr.msk.f32.mxu0 %vm442_vm4, %v3659_v56 }
 0x2df   :  { %3076 = vmatmul.mubr.msk.f32.gmra.mxu0 %vm442_vm4, %v3655_v55 }
 0x39b   :  { %v3074_v62 = vpop.f32.mrf.mxu0 }
 0x39c   :  { %v531_v0 = vadd.f32 %v3074_v62, %v3684_v61 }
 0x39d   :  { %v525_v1 = vpop.f32.mrf.mxu0 }
 0x39e   :  { %v526_v3 = vadd.f32 %v525_v1, %v3689_v63  ;;  %v548_v4 = vsel %vm544_vm5, %v531_v0, -inf }
 0x39f   :  { %549 = vmax.xlane.f32.xlu1 %v548_v4  ;;  %v3077_v5 = vpop.f32.mrf.mxu0 }
 0x3a0   :  { %v541_v6 = vadd.f32 %v3077_v5, %v3695_v2  ;;  %v545_v7 = vsel %vm544_vm5, %v526_v3, -inf }
 0x3a1   :  { %v535_v8 = vpop.f32.mrf.mxu0  ;;  %546 = vmax.xlane.f32.xlu0 %v545_v7 }
 0x3a2   :  { %v536_v10 = vadd.f32 %v535_v8, %v3704_v9  ;;  %v554_v11 = vsel %vm544_vm5, %v541_v6, -inf }
 0x3a4   :  { %v551_v12 = vsel %vm544_vm5, %v536_v10, -inf }
 0x3a5   :  { %555 = vmax.xlane.f32.xlu0 %v554_v11 }
 0x3a9   :  { %552 = vmax.xlane.f32.xlu0 %v551_v12 }
 0x3b0   :  { %593 = vrot.lane.b32.xlu1 %v3659_v56, %s3427_s30 }
 0x3b4   :  { %591 = vrot.lane.b32.xlu1 %v3649_v53, %s3427_s30 }
 0x3b8   :  { %589 = vrot.lane.b32.xlu1 %v3651_v54, %s3427_s30 }
 0x3bf   :  { %595 = vrot.lane.b32.xlu0 %v3655_v55, %s3427_s30 }
 0x428   :  { %v550_v13 = vpop.xlane.xlu1 %549 }
 0x429   :  { %v558_v14 = vsub.f32 %v531_v0, %v550_v13 }
 0x42a   :  { %v547_v15 = vpop.xlane.xlu0 %546 }
 0x42b   :  { %v563_v16 = vmul.f32 1.442695, %v558_v14  ;;  %v557_v17 = vsub.f32 %v526_v3, %v547_v15 }
 0x42c   :  { %v594_v20 = vpop.permute.xlu1 %593 }
 0x42d   :  { %3294 = vpow2.f32 %v563_v16  ;;  %v561_v18 = vmul.f32 1.442695, %v557_v17 }
 0x42e   :  { %v556_v19 = vpop.xlane.xlu0 %555 }
 0x42f   :  { %3296 = vpow2.f32 %v561_v18  ;;  %v560_v29 = vsub.f32 %v541_v6, %v556_v19 }
 0x430   :  { %v592_v22 = vpop.permute.xlu1 %591 }
 0x431   :  { %v567_v31 = vmul.f32 1.442695, %v560_v29 }
 0x432   :  { %v553_v21 = vpop.xlane.xlu0 %552 }
 0x433   :  { %v559_v30 = vsub.f32 %v536_v10, %v553_v21  ;;  %3298 = vpow2.f32 %v567_v31 }
 0x434   :  { %v590_v27 = vpop.permute.xlu1 %589 }
 0x435   :  { %v565_v32 = vmul.f32 1.442695, %v559_v30 }
 0x436   :  { %v596_v23 = vpop.permute.xlu0 %595 }
 0x437   :  { %3078 = vmatprep.subr.mxu1 %v596_v23  ;;  %3300 = vpow2.f32 %v565_v32 }
 0x438   :  { %3079 = vmatpush3.msra.mxu1 %v596_v23 }
 0x439   :  { %3080 = vmatprep.subr.mxu1 %v594_v20 }
 0x43a   :  { %v3295_v24 = vpop.eup %3294  ;;  %3081 = vmatpush3.msra.mxu1 %v594_v20 }
 0x43b   :  { %3082 = vmatprep.subr.mxu1 %v592_v22  ;;  %v572_v25 = vsel %vm544_vm5, %v3295_v24, 0.0 }
 0x43c   :  { %v3297_v26 = vpop.eup %3296  ;;  %573 = vadd.xlane.f32.xlu1 %v572_v25  ;;  %3083 = vmatpush3.msra.mxu1 %v592_v22 }
 0x43d   :  { %3084 = vmatprep.subr.mxu1 %v590_v27  ;;  %v569_v28 = vsel %vm544_vm5, %v3297_v26, 0.0 }
 0x43e   :  { %570 = vadd.xlane.f32.xlu0 %v569_v28  ;;  %3085 = vmatpush3.msra.mxu1 %v590_v27 }
 0x440   :  { %v3299_v33 = vpop.eup %3298 }
 0x441   :  { %v578_v36 = vsel %vm544_vm5, %v3299_v33, 0.0 }
 0x444   :  { %v3301_v35 = vpop.eup %3300 }
 0x445   :  { %v575_v37 = vsel %vm544_vm5, %v3301_v35, 0.0 }
 0x44d   :  { %710 = vrot.lane.b32.xlu1 %v3659_v56, %s3428_s26 }
 0x454   :  { %712 = vrot.lane.b32.xlu0 %v3655_v55, %s3428_s26 }
 0x471   :  { %579 = vadd.xlane.f32.xlu1 %v578_v36 }
 0x473   :  { %576 = vadd.xlane.f32.xlu0 %v575_v37 }
 0x482   :  { %706 = vrot.lane.b32.xlu1 %v3651_v54, %s3428_s26 }
 0x486   :  { %700 = vrot.lane.b32.xlu1 %v3649_v53, %s3429_s0 }
 0x489   :  { %708 = vrot.lane.b32.xlu0 %v3649_v53, %s3428_s26 }
 0x48a   :  { %704 = vrot.lane.b32.xlu1 %v3655_v55, %s3429_s0 }
 0x48d   :  { %698 = vrot.lane.b32.xlu0 %v3651_v54, %s3429_s0 }
 0x491   :  { %702 = vrot.lane.b32.xlu0 %v3659_v56, %s3429_s0 }
 0x4c5   :  { %v574_v38 = vpop.xlane.xlu1 %573 }
 0x4c6   :  { %3302 = vrcp.f32 %v574_v38 }
 0x4c7   :  { %v571_v40 = vpop.xlane.xlu0 %570 }
 0x4c8   :  { %3304 = vrcp.f32 %v571_v40 }
 0x4c9   :  { %v711_v46 = vpop.permute.xlu1 %710 }
 0x4cb   :  { %v713_v41 = vpop.permute.xlu0 %712 }
 0x4cc   :  { %3092 = vmatprep.subr.msk.mxu1 %vm442_vm4, %v713_v41 }
 0x4d3   :  { %v3303_v42 = vpop.eup %3302 }
 0x4d4   :  { %v586_v45 = vmul.f32 %v3303_v42, %v3295_v24 }
 0x4d5   :  { %v3305_v43 = vpop.eup %3304 }
 0x4d6   :  { %v585_v44 = vmul.f32 %v3305_v43, %v3297_v26 }
 0x4d8   :  { %3086 = vmatprep.mubr.msk.f32.mxu1 %vm544_vm5, %v585_v44 }
 0x4d9   :  { %3087 = vmatmul.mubr.msk.f32.vlgmr.msra.gmra.mxu1 %vm544_vm5, %v586_v45 }
 0x4da   :  { %3093 = vmatpush3.xpose.msk.msra.mxu1 %vm442_vm4, %v713_v41 }
 0x4db   :  { %3094 = vmatprep.subr.msk.mxu1 %vm442_vm4, %v711_v46 }
 0x4de   :  { %3095 = vmatpush3.xpose.msk.msra.mxu1 %vm442_vm4, %v711_v46 }
 0x4fa   :  { %v580_v47 = vpop.xlane.xlu1 %579 }
 0x4fb   :  { %3306 = vrcp.f32 %v580_v47 }
 0x4fc   :  { %v577_v48 = vpop.xlane.xlu0 %576 }
 0x4fd   :  { %3308 = vrcp.f32 %v577_v48 }
 0x4fe   :  { %v707_v51 = vpop.permute.xlu1 %706 }
 0x500   :  { %v709_v49 = vpop.permute.xlu0 %708 }
 0x501   :  { %3096 = vmatprep.subr.msk.mxu1 %vm442_vm4, %v709_v49 }
 0x502   :  { %3097 = vmatpush3.xpose.msk.msra.mxu1 %vm442_vm4, %v709_v49  ;;  %v701_v0 = vpop.permute.xlu1 %700 }
 0x503   :  { %3098 = vmatprep.subr.msk.mxu1 %vm442_vm4, %v707_v51 }
 0x504   :  { %v699_v60 = vpop.permute.xlu0 %698 }
 0x506   :  { %3099 = vmatpush3.xpose.msk.msra.mxu1 %vm442_vm4, %v707_v51  ;;  %v705_v3 = vpop.permute.xlu1 %704 }
 0x508   :  { %v3307_v57 = vpop.eup %3306  ;;  %v703_v1 = vpop.permute.xlu0 %702 }
 0x509   :  { %v588_v62 = vmul.f32 %v3307_v57, %v3299_v33 }
 0x50a   :  { %v3309_v58 = vpop.eup %3308 }
 0x50b   :  { %v587_v59 = vmul.f32 %v3309_v58, %v3301_v35 }
 0x50d   :  { %3089 = vmatprep.mubr.msk.f32.mxu1 %vm544_vm5, %v587_v59 }
 0x50e   :  { %3090 = vmatmul.mubr.msk.f32.gmra.mxu1 %vm544_vm5, %v588_v62  ;;  %v991_v62 = vld [vmem:[%s4219_s8 + $0x18] sm:$0xff] }
 0x50f   :  { %3100 = vmatprep.mubr.msk.f32.mxu1 %vm442_vm4, %v699_v60 }
 0x512   :  { %3101 = vmatmul.mubr.msk.f32.vlgmr.msra.gmra.mxu1 %vm442_vm4, %v701_v0  ;;  %v990_v0 = vld [vmem:[%s4219_s8 + $0x10] sm:$0xff] }
 0x513   :  { %3103 = vmatprep.mubr.msk.f32.mxu1 %vm442_vm4, %v703_v1  ;;  %v989_v1 = vld [vmem:[%s4219_s8 + $0x8] sm:$0xff] }
 0x516   :  { %3104 = vmatmul.mubr.msk.f32.gmra.mxu1 %vm442_vm4, %v705_v3  ;;  %v988_v3 = vld [vmem:[%s4219_s8] sm:$0xff] }
 0x599   :  { %v3753_v4 = vpop.f32.mrf.mxu1 }
 0x59b   :  { %v3755_v5 = vpop.f32.mrf.mxu1 }
 0x5ce   :  { %v3757_v6 = vpop.f32.mrf.mxu1 }
 0x5d0   :  { %v3759_v7 = vpop.f32.mrf.mxu1 }
 0x5d2   :  { %v3102_v8 = vpop.f32.mrf.mxu1 }
 0x5d3   :  { %v802_v10 = vadd.f32 %v3102_v8, %v3684_v61 }
 0x5d4   :  { %v796_v11 = vpop.f32.mrf.mxu1 }
 0x5d5   :  { %v797_v12 = vadd.f32 %v796_v11, %v3689_v63  ;;  %v818_v13 = vsel %vm544_vm5, %v802_v10, -inf }
 0x5d6   :  { %819 = vmax.xlane.f32.xlu1 %v818_v13  ;;  %v3105_v14 = vpop.f32.mrf.mxu1 }
 0x5d7   :  { %v815_v15 = vsel %vm544_vm5, %v797_v12, -inf  ;;  %v812_v18 = vadd.f32 %v3105_v14, %v3695_v2 }
 0x5d8   :  { %816 = vmax.xlane.f32.xlu0 %v815_v15  ;;  %v806_v16 = vpop.f32.mrf.mxu1 }
 0x5d9   :  { %v807_v17 = vadd.f32 %v806_v16, %v3704_v9  ;;  %v824_v20 = vsel %vm544_vm5, %v812_v18, -inf }
 0x5db   :  { %v821_v19 = vsel %vm544_vm5, %v807_v17, -inf }
 0x5dc   :  { %822 = vmax.xlane.f32.xlu0 %v821_v19 }
 0x5e0   :  { %825 = vmax.xlane.f32.xlu0 %v824_v20 }
 0x65f   :  { %v820_v21 = vpop.xlane.xlu1 %819 }
 0x660   :  { %v828_v22 = vsub.f32 %v802_v10, %v820_v21 }
 0x661   :  { %v817_v23 = vpop.xlane.xlu0 %816 }
 0x662   :  { %v833_v24 = vmul.f32 1.442695, %v828_v22  ;;  %v827_v25 = vsub.f32 %v797_v12, %v817_v23 }
 0x664   :  { %3310 = vpow2.f32 %v833_v24  ;;  %v831_v26 = vmul.f32 1.442695, %v827_v25 }
 0x665   :  { %v823_v27 = vpop.xlane.xlu0 %822 }
 0x666   :  { %3312 = vpow2.f32 %v831_v26  ;;  %v829_v28 = vsub.f32 %v807_v17, %v823_v27 }
 0x668   :  { %v835_v29 = vmul.f32 1.442695, %v829_v28 }
 0x669   :  { %v826_v30 = vpop.xlane.xlu0 %825 }
 0x66a   :  { %3314 = vpow2.f32 %v835_v29  ;;  %v830_v31 = vsub.f32 %v812_v18, %v826_v30 }
 0x66c   :  { %v837_v32 = vmul.f32 1.442695, %v830_v31 }
 0x66e   :  { %3316 = vpow2.f32 %v837_v32 }
 0x671   :  { %v3311_v33 = vpop.eup %3310 }
 0x672   :  { %v842_v35 = vsel %vm544_vm5, %v3311_v33, 0.0 }
 0x673   :  { %v3313_v36 = vpop.eup %3312  ;;  %843 = vadd.xlane.f32.xlu1 %v842_v35 }
 0x674   :  { %v839_v37 = vsel %vm544_vm5, %v3313_v36, 0.0 }
 0x675   :  { %840 = vadd.xlane.f32.xlu0 %v839_v37 }
 0x677   :  { %v3315_v38 = vpop.eup %3314 }
 0x678   :  { %v845_v40 = vsel %vm544_vm5, %v3315_v38, 0.0 }
 0x679   :  { %846 = vadd.xlane.f32.xlu0 %v845_v40  ;;  %v1188_v40 = vld [vmem:[%s4223_s12 + $0x10] sm:$0xf] }
 0x67a   :  { %3134 = vmatprep.subr.msk.mxu1 %vm341_vm3, %v1188_v40 }
 0x67b   :  { %v3317_v41 = vpop.eup %3316  ;;  %3135 = vmatpush3.msk.msra.mxu1 %vm341_vm3, %v1188_v40  ;;  %v1316_v40 = vld [vmem:[%s4225_s14] sm:$0xff] }
 0x67c   :  { %v848_v42 = vsel %vm544_vm5, %v3317_v41, 0.0 }
 0x67d   :  { %849 = vadd.xlane.f32.xlu1 %v848_v42  ;;  %v1186_v42 = vld [vmem:[%s4223_s12] sm:$0xff] }
 0x68e   :  { %863 = vrot.lane.b32.xlu1 %v3659_v56, %s3430_s21 }
 0x68f   :  { %865 = vrot.lane.b32.xlu0 %v3655_v55, %s3430_s21 }
 0x692   :  { %861 = vrot.lane.b32.xlu1 %v3649_v53, %s3430_s21 }
 0x696   :  { %859 = vrot.lane.b32.xlu1 %v3651_v54, %s3430_s21 }
 0x6fc   :  { %v844_v44 = vpop.xlane.xlu1 %843 }
 0x6fe   :  { %v841_v43 = vpop.xlane.xlu0 %840 }
 0x6ff   :  { %3318 = vrcp.f32 %v841_v43 }
 0x700   :  { %3320 = vrcp.f32 %v844_v44 }
 0x702   :  { %v847_v45 = vpop.xlane.xlu0 %846 }
 0x703   :  { %3322 = vrcp.f32 %v847_v45 }
 0x706   :  { %v850_v46 = vpop.xlane.xlu1 %849  ;;  %v866_v47 = vpop.permute.xlu0 %865 }
 0x707   :  { %3324 = vrcp.f32 %v850_v46  ;;  %3106 = vmatprep.subr.mxu0 %v866_v47 }
 0x708   :  { %3107 = vmatpush3.msra.mxu0 %v866_v47 }
 0x70a   :  { %v864_v56 = vpop.permute.xlu1 %863 }
 0x70b   :  { %3108 = vmatprep.subr.mxu0 %v864_v56 }
 0x70c   :  { %v3319_v55 = vpop.eup %3318  ;;  %3109 = vmatpush3.msra.mxu0 %v864_v56 }
 0x70d   :  { %v855_v48 = vmul.f32 %v3319_v55, %v3313_v36  ;;  %v3321_v54 = vpop.eup %3320 }
 0x70e   :  { %v862_v53 = vpop.permute.xlu1 %861  ;;  %v856_v57 = vmul.f32 %v3321_v54, %v3311_v33 }
 0x70f   :  { %3110 = vmatprep.subr.mxu0 %v862_v53  ;;  %3114 = vmatprep.mubr.msk.f32.mxu0 %vm544_vm5, %v855_v48 }
 0x710   :  { %3111 = vmatpush3.msra.mxu0 %v862_v53  ;;  %v3323_v49 = vpop.eup %3322 }
 0x711   :  { %v857_v59 = vmul.f32 %v3323_v49, %v3315_v38 }
 0x712   :  { %v860_v51 = vpop.permute.xlu1 %859 }
 0x713   :  { %3112 = vmatprep.subr.mxu0 %v860_v51 }
 0x714   :  { %v3325_v58 = vpop.eup %3324  ;;  %3113 = vmatpush3.msra.mxu0 %v860_v51 }
 0x715   :  { %3115 = vmatmul.mubr.msk.f32.vlgmr.msra.gmra.mxu0 %vm544_vm5, %v856_v57  ;;  %v858_v60 = vmul.f32 %v3325_v58, %v3317_v41  ;;  %3120 = vmatprep.subr.mxu0 %v991_v62  ;;  %v1187_v41 = vld [vmem:[%s4223_s12 + $0x8] sm:$0xff] }
 0x716   :  { %3117 = vmatprep.mubr.msk.f32.mxu0 %vm544_vm5, %v857_v59  ;;  %3121 = vmatpush3.msra.mxu0 %v991_v62 }
 0x717   :  { %3122 = vmatprep.subr.mxu0 %v990_v0  ;;  %3136 = vmatprep.subr.mxu1 %v1187_v41 }
 0x718   :  { %3123 = vmatpush3.msra.mxu0 %v990_v0  ;;  %3137 = vmatpush3.msra.mxu1 %v1187_v41  ;;  %v2809_v41 = vld [vmem:[%s4224_s13] ss:$0 sm:$0xff] }
 0x719   :  { %3118 = vmatmul.mubr.msk.f32.gmra.mxu0 %vm544_vm5, %v858_v60  ;;  %3124 = vmatprep.subr.mxu0 %v989_v1 }
 0x71a   :  { %3125 = vmatpush3.msra.mxu0 %v989_v1  ;;  %3138 = vmatprep.subr.mxu1 %v1186_v42 }
 0x71b   :  { %3126 = vmatprep.subr.mxu0 %v988_v3  ;;  %3139 = vmatpush3.msra.mxu1 %v1186_v42 }
 0x71c   :  { %3127 = vmatpush3.msra.mxu0 %v988_v3 }
 0x7d5   :  { %v3116_v8 = vpop.f32.mrf.mxu0 }
 0x7d6   :  { %974 = vrot.lane.b32.xlu1 %v3116_v8, %s3431_s29 }
 0x7d7   :  { %v949_v10 = vpop.f32.mrf.mxu0 }
 0x7d8   :  { %972 = vrot.lane.b32.xlu0 %v949_v10, %s3431_s29 }
 0x7d9   :  { %v3119_v11 = vpop.f32.mrf.mxu0 }
 0x7da   :  { %978 = vrot.lane.b32.xlu1 %v3119_v11, %s3431_s29 }
 0x7db   :  { %v959_v12 = vpop.f32.mrf.mxu0 }
 0x7dc   :  { %976 = vrot.lane.b32.xlu0 %v959_v12, %s3431_s29 }
 0x848   :  { %v975_v13 = vpop.permute.xlu1 %974 }
 0x849   :  { %v985_v16 = vsel %vm442_vm4, %v3753_v4, %v975_v13  ;;  %v2806_v4 = vld [vmem:[%s4220_s9] ss:$0 sm:$0xff] }
 0x84a   :  { %v973_v14 = vpop.permute.xlu0 %972 }
 0x84b   :  { %v984_v15 = vsel %vm442_vm4, %v3755_v5, %v973_v14 }
 0x84c   :  { %3128 = vmatprep.mubr.msk.f32.mxu0 %vm544_vm5, %v984_v15  ;;  %v979_v17 = vpop.permute.xlu1 %978 }
 0x84d   :  { %3129 = vmatmul.mubr.msk.f32.vlgmr.msra.gmra.mxu0 %vm544_vm5, %v985_v16  ;;  %v987_v20 = vsel %vm442_vm4, %v3757_v6, %v979_v17 }
 0x84e   :  { %v977_v18 = vpop.permute.xlu0 %976 }
 0x84f   :  { %v986_v19 = vsel %vm442_vm4, %v3759_v7, %v977_v18 }
 0x850   :  { %3131 = vmatprep.mubr.msk.f32.mxu0 %vm544_vm5, %v986_v19 }
 0x851   :  { %3132 = vmatmul.mubr.msk.f32.gmra.mxu0 %vm544_vm5, %v987_v20 }
 0x90d   :  { %v3130_v5 = vpop.f32.mrf.mxu0 }
 0x90e   :  { %v1090_v21 = vadd.f32 %v3130_v5, %v3590_v34  ;;  %v2807_v5 = vld [vmem:[%s4221_s10] ss:$0 sm:$0xff] }
 0x90f   :  { %v1070_v22 = vpop.f32.mrf.mxu0 }
 0x910   :  { %v3817_v23 = vadd.f32 %v2806_v4, %v1090_v21  ;;  %v1089_v24 = vadd.f32 %v1070_v22, %v3592_v39 }
 0x911   :  { %v3133_v7 = vpop.f32.mrf.mxu0 }
 0x912   :  { %v3820_v25 = vadd.f32 %v2806_v4, %v1089_v24  ;;  %v1092_v6 = vadd.f32 %v3133_v7, %v3611_v52  ;;  %v1109_v26 = vsel %vm244_vm2, %v3817_v23, 0.0  ;;  %v1123_v34 = vmul.f32 %v3817_v23, %v3817_v23  ;;  %v2808_v7 = vld [vmem:[%s4222_s11] ss:$0 sm:$0xff] }
 0x913   :  { %1110 = vadd.xlane.f32.xlu1 %v1109_v26  ;;  %v1080_v29 = vpop.f32.mrf.mxu0 }
 0x914   :  { %v3825_v27 = vadd.f32 %v2806_v4, %v1092_v6  ;;  %v1106_v28 = vsel %vm244_vm2, %v3820_v25, 0.0  ;;  %v1091_v30 = vadd.f32 %v1080_v29, %v3607_v50  ;;  %v1129_v31 = vsel %vm244_vm2, %v1123_v34, 0.0 }
 0x915   :  { %1107 = vadd.xlane.f32.xlu0 %v1106_v28  ;;  %v1122_v32 = vmul.f32 %v3820_v25, %v3820_v25 }
 0x916   :  { %v1115_v39 = vsel %vm244_vm2, %v3825_v27, 0.0  ;;  %v1125_v52 = vmul.f32 %v3825_v27, %v3825_v27  ;;  %v3840_v35 = vadd.f32 %v2806_v4, %v1091_v30 }
 0x917   :  { %1116 = vadd.xlane.f32.xlu1 %v1115_v39  ;;  %v1126_v36 = vsel %vm244_vm2, %v1122_v32, 0.0 }
 0x918   :  { %v1135_v33 = vsel %vm244_vm2, %v1125_v52, 0.0  ;;  %v1112_v37 = vsel %vm244_vm2, %v3840_v35, 0.0  ;;  %v1124_v50 = vmul.f32 %v3840_v35, %v3840_v35 }
 0x919   :  { %1130 = vadd.xlane.f32.xlu0 %v1129_v31 }
 0x91a   :  { %v1132_v38 = vsel %vm244_vm2, %v1124_v50, 0.0  ;;  %v1318_v50 = vld [vmem:[%s4225_s14 + $0x10] sm:$0xff] }
 0x91b   :  { %1136 = vadd.xlane.f32.xlu1 %v1135_v33 }
 0x91d   :  { %1127 = vadd.xlane.f32.xlu0 %v1126_v36 }
 0x921   :  { %1113 = vadd.xlane.f32.xlu0 %v1112_v37  ;;  %v1319_v37 = vld [vmem:[%s4225_s14 + $0x18] sm:$0xff] }
 0x922   :  { %3146 = vmatprep.subr.mxu0 %v1319_v37 }
 0x923   :  { %3147 = vmatpush3.msra.mxu0 %v1319_v37  ;;  %v2824_v37 = vld [vmem:[%s4218_s7 + $0x18] sm:$0xff] }
 0x924   :  { %3148 = vmatprep.subr.mxu0 %v1318_v50 }
 0x925   :  { %1133 = vadd.xlane.f32.xlu0 %v1132_v38  ;;  %3149 = vmatpush3.msra.mxu0 %v1318_v50  ;;  %v1317_v38 = vld [vmem:[%s4225_s14 + $0x8] sm:$0xff] }
 0x926   :  { %3150 = vmatprep.subr.mxu0 %v1317_v38 }
 0x927   :  { %3151 = vmatpush3.msra.mxu0 %v1317_v38 }
 0x928   :  { %3152 = vmatprep.subr.mxu0 %v1316_v40 }
 0x929   :  { %3153 = vmatpush3.msra.mxu0 %v1316_v40 }
 0x99c   :  { %v1111_v43 = vpop.xlane.xlu1 %1110 }
 0x99d   :  { %v1119_v45 = vmul.f32 0.05, %v1111_v43 }
 0x99e   :  { %v1108_v44 = vpop.xlane.xlu0 %1107 }
 0x99f   :  { %v1143_v55 = vmul.f32 %v1119_v45, %v1119_v45  ;;  %v1118_v48 = vmul.f32 0.05, %v1108_v44  ;;  %v1151_v18 = vsub.f32 %v3817_v23, %v1119_v45 }
 0x9a0   :  { %v1117_v46 = vpop.xlane.xlu1 %1116 }
 0x9a1   :  { %v1121_v47 = vmul.f32 0.05, %v1117_v46  ;;  %v1142_v59 = vmul.f32 %v1118_v48, %v1118_v48  ;;  %v1150_v20 = vsub.f32 %v3820_v25, %v1118_v48 }
 0x9a2   :  { %v1131_v56 = vpop.xlane.xlu0 %1130 }
 0x9a3   :  { %v1139_v53 = vmul.f32 0.05, %v1131_v56  ;;  %v1145_v57 = vmul.f32 %v1121_v47, %v1121_v47  ;;  %v1153_v26 = vsub.f32 %v3825_v27, %v1121_v47 }
 0x9a4   :  { %v1137_v54 = vpop.xlane.xlu1 %1136 }
 0x9a5   :  { %v1147_v49 = vsub.f32 %v1139_v53, %v1143_v55  ;;  %v1141_v51 = vmul.f32 0.05, %v1137_v54 }
 0x9a6   :  { %v1128_v58 = vpop.xlane.xlu0 %1127 }
 0x9a7   :  { %v1155_v60 = vadd.f32 1e-05, %v1147_v49  ;;  %v1138_v62 = vmul.f32 0.05, %v1128_v58  ;;  %v1149_v0 = vsub.f32 %v1141_v51, %v1145_v57 }
 0x9a9   :  { %3326 = vrsqrt.f32 %v1155_v60  ;;  %v1146_v1 = vsub.f32 %v1138_v62, %v1142_v59  ;;  %v1157_v11 = vadd.f32 1e-05, %v1149_v0 }
 0x9aa   :  { %v1114_v3 = vpop.xlane.xlu0 %1113 }
 0x9ab   :  { %v1154_v8 = vadd.f32 1e-05, %v1146_v1  ;;  %v1120_v10 = vmul.f32 0.05, %v1114_v3 }
 0x9ad   :  { %3328 = vrsqrt.f32 %v1154_v8  ;;  %v1144_v13 = vmul.f32 %v1120_v10, %v1120_v10  ;;  %v1152_v39 = vsub.f32 %v3840_v35, %v1120_v10 }
 0x9ae   :  { %v1134_v12 = vpop.xlane.xlu0 %1133  ;;  %3330 = vrsqrt.f32 %v1157_v11 }
 0x9af   :  { %v1140_v14 = vmul.f32 0.05, %v1134_v12 }
 0x9b1   :  { %v1148_v15 = vsub.f32 %v1140_v14, %v1144_v13 }
 0x9b3   :  { %v1156_v16 = vadd.f32 1e-05, %v1148_v15 }
 0x9b5   :  { %3332 = vrsqrt.f32 %v1156_v16 }
 0x9b6   :  { %v3327_v17 = vpop.eup %3326 }
 0x9b7   :  { %v1163_v19 = vmul.f32 %v3327_v17, %v1151_v18  ;;  %v2819_v17 = vld [vmem:[%s4226_s15] ss:$0 sm:$0xff] }
 0x9b9   :  { %v1173_v22 = vmul.f32 %v2807_v5, %v1163_v19 }
 0x9ba   :  { %v3329_v4 = vpop.eup %3328 }
 0x9bb   :  { %v1162_v21 = vmul.f32 %v3329_v4, %v1150_v20  ;;  %v3331_v24 = vpop.eup %3330  ;;  %v1183_v34 = vadd.f32 %v2808_v7, %v1173_v22 }
 0x9bc   :  { %v1165_v29 = vmul.f32 %v3331_v24, %v1153_v26 }
 0x9bd   :  { %v1172_v6 = vmul.f32 %v2807_v5, %v1162_v21 }
 0x9be   :  { %v1175_v31 = vmul.f32 %v2807_v5, %v1165_v29 }
 0x9bf   :  { %v1182_v28 = vadd.f32 %v2808_v7, %v1172_v6 }
 0x9c0   :  { %v1185_v36 = vadd.f32 %v2808_v7, %v1175_v31 }
 0x9c1   :  { %3140 = vmatprep.mubr.msk.f32.mxu1 %vm244_vm2, %v1182_v28 }
 0x9c2   :  { %v3333_v52 = vpop.eup %3332  ;;  %3141 = vmatmul.mubr.msk.f32.vlgmr.msra.gmra.mxu1 %vm244_vm2, %v1183_v34 }
 0x9c3   :  { %v1164_v30 = vmul.f32 %v3333_v52, %v1152_v39 }
 0x9c5   :  { %v1174_v32 = vmul.f32 %v2807_v5, %v1164_v30 }
 0x9c7   :  { %v1184_v33 = vadd.f32 %v2808_v7, %v1174_v32 }
 0x9c9   :  { %3143 = vmatprep.mubr.msk.f32.mxu1 %vm244_vm2, %v1184_v33  ;;  %v2826_v33 = vld [vmem:[%s4218_s7 + $0x28] sm:$0xf] }
 0x9ca   :  { %3144 = vmatmul.mubr.msk.f32.gmra.mxu1 %vm244_vm2, %v1185_v36  ;;  %v2825_v36 = vld [vmem:[%s4218_s7 + $0x20] sm:$0xff]  ;;  %3160 = vmatprep.subr.msk.mxu1 %vm341_vm3, %v2826_v33 }
 0x9cb   :  { %3161 = vmatpush3.msk.msra.mxu1 %vm341_vm3, %v2826_v33 }
 0x9cc   :  { %3162 = vmatprep.subr.mxu1 %v2825_v36 }
 0x9cd   :  { %3163 = vmatpush3.msra.mxu1 %v2825_v36 }
 0x9ce   :  { %3164 = vmatprep.subr.mxu1 %v2824_v37 }
 0x9cf   :  { %3165 = vmatpush3.msra.mxu1 %v2824_v37 }
 0xa82   :  { %v3142_v42 = vpop.f32.mrf.mxu1 }
 0xa83   :  { %v1283_v43 = vadd.f32 %v3142_v42, %v2809_v41 }
 0xa84   :  { %v1277_v44 = vpop.f32.mrf.mxu1 }
 0xa85   :  { %v1301_v45 = vmul.f32 0.70710677, %v1283_v43  ;;  %v1278_v46 = vadd.f32 %v2809_v41, %v1277_v44  ;;  %v1297_v62 = vmul.f32 0.5, %v1283_v43 }
 0xa87   :  { %3334 = verf.f32 %v1301_v45  ;;  %v1300_v47 = vmul.f32 0.70710677, %v1278_v46  ;;  %v1296_v59 = vmul.f32 0.5, %v1278_v46 }
 0xa89   :  { %3336 = verf.f32 %v1300_v47 }
 0xa8a   :  { %v3145_v56 = vpop.f32.mrf.mxu1 }
 0xa8b   :  { %v1293_v55 = vadd.f32 %v3145_v56, %v2809_v41 }
 0xa8c   :  { %v1287_v48 = vpop.f32.mrf.mxu1 }
 0xa8d   :  { %v1303_v53 = vmul.f32 0.70710677, %v1293_v55  ;;  %v1288_v54 = vadd.f32 %v2809_v41, %v1287_v48  ;;  %v1299_v13 = vmul.f32 0.5, %v1293_v55 }
 0xa8f   :  { %3338 = verf.f32 %v1303_v53  ;;  %v1302_v49 = vmul.f32 0.70710677, %v1288_v54  ;;  %v1298_v11 = vmul.f32 0.5, %v1288_v54 }
 0xa91   :  { %3340 = verf.f32 %v1302_v49 }
 0xa94   :  { %v3335_v51 = vpop.eup %3334 }
 0xa95   :  { %v1309_v58 = vadd.f32 1.0, %v3335_v51 }
 0xa96   :  { %v3337_v57 = vpop.eup %3336 }
 0xa97   :  { %v1308_v60 = vadd.f32 1.0, %v3337_v57  ;;  %v1313_v1 = vmul.f32 %v1309_v58, %v1297_v62 }
 0xa99   :  { %v1312_v0 = vmul.f32 %v1308_v60, %v1296_v59 }
 0xa9b   :  { %3154 = vmatprep.mubr.msk.f32.mxu0 %vm544_vm5, %v1312_v0 }
 0xa9c   :  { %v3339_v3 = vpop.eup %3338  ;;  %3155 = vmatmul.mubr.msk.f32.vlgmr.msra.gmra.mxu0 %vm544_vm5, %v1313_v1 }
 0xa9d   :  { %v1311_v10 = vadd.f32 1.0, %v3339_v3 }
 0xa9e   :  { %v3341_v8 = vpop.eup %3340 }
 0xa9f   :  { %v1310_v12 = vadd.f32 1.0, %v3341_v8  ;;  %v1315_v15 = vmul.f32 %v1311_v10, %v1299_v13 }
 0xaa1   :  { %v1314_v14 = vmul.f32 %v1310_v12, %v1298_v11 }
 0xaa3   :  { %3157 = vmatprep.mubr.msk.f32.mxu0 %vm544_vm5, %v1314_v14 }
 0xaa4   :  { %3158 = vmatmul.mubr.msk.f32.gmra.mxu0 %vm544_vm5, %v1315_v15 }
 0xb5c   :  { %v3156_v16 = vpop.f32.mrf.mxu0 }
 0xb5d   :  { %v1418_v18 = vadd.f32 %v3156_v16, %v3817_v23  ;;  %v2822_v16 = vld [vmem:[%s4216_s5 + $0x1] ss:$0 sm:$0xff] }
 0xb5e   :  { %v1398_v19 = vpop.f32.mrf.mxu0 }
 0xb5f   :  { %v3896_v20 = vadd.f32 %v2819_v17, %v1418_v18  ;;  %v1417_v5 = vadd.f32 %v1398_v19, %v3820_v25 }
 0xb61   :  { %v3899_v4 = vadd.f32 %v2819_v17, %v1417_v5  ;;  %v1439_v21 = vsel %vm244_vm2, %v3896_v20, 0.0  ;;  %v1453_v22 = vmul.f32 %v3896_v20, %v3896_v20  ;;  %v2823_v5 = vld [vmem:[%s4217_s6 + $0x1] ss:$0 sm:$0xff] }
 0xb62   :  { %1440 = vadd.xlane.f32.xlu1 %v1439_v21 }
 0xb63   :  { %v1436_v24 = vsel %vm244_vm2, %v3899_v4, 0.0  ;;  %v1452_v23 = vmul.f32 %v3899_v4, %v3899_v4  ;;  %v1459_v25 = vsel %vm244_vm2, %v1453_v22, 0.0 }
 0xb64   :  { %1437 = vadd.xlane.f32.xlu0 %v1436_v24  ;;  %v3159_v7 = vpop.f32.mrf.mxu0 }
 0xb65   :  { %v1420_v6 = vadd.f32 %v3159_v7, %v3825_v27  ;;  %v1456_v29 = vsel %vm244_vm2, %v1452_v23, 0.0 }
 0xb66   :  { %1460 = vadd.xlane.f32.xlu1 %v1459_v25  ;;  %v1408_v26 = vpop.f32.mrf.mxu0 }
 0xb67   :  { %v3911_v28 = vadd.f32 %v2819_v17, %v1420_v6  ;;  %v1419_v34 = vadd.f32 %v1408_v26, %v3840_v35 }
 0xb68   :  { %1457 = vadd.xlane.f32.xlu0 %v1456_v29 }
 0xb69   :  { %v3915_v39 = vadd.f32 %v2819_v17, %v1419_v34  ;;  %v1445_v52 = vsel %vm244_vm2, %v3911_v28, 0.0  ;;  %v1455_v30 = vmul.f32 %v3911_v28, %v3911_v28 }
 0xb6a   :  { %1446 = vadd.xlane.f32.xlu1 %v1445_v52 }
 0xb6b   :  { %v1442_v27 = vsel %vm244_vm2, %v3915_v39, 0.0  ;;  %v1454_v31 = vmul.f32 %v3915_v39, %v3915_v39  ;;  %v1465_v35 = vsel %vm244_vm2, %v1455_v30, 0.0 }
 0xb6c   :  { %1443 = vadd.xlane.f32.xlu0 %v1442_v27 }
 0xb6d   :  { %v1462_v32 = vsel %vm244_vm2, %v1454_v31, 0.0 }
 0xb6e   :  { %1466 = vadd.xlane.f32.xlu1 %v1465_v35 }
 0xb70   :  { %1463 = vadd.xlane.f32.xlu0 %v1462_v32 }
 0xbeb   :  { %v1441_v50 = vpop.xlane.xlu1 %1440 }
 0xbec   :  { %v1449_v38 = vmul.f32 0.05, %v1441_v50 }
 0xbed   :  { %v1438_v40 = vpop.xlane.xlu0 %1437 }
 0xbee   :  { %v1448_v41 = vmul.f32 0.05, %v1438_v40  ;;  %v1473_v43 = vmul.f32 %v1449_v38, %v1449_v38  ;;  %v1481_v12 = vsub.f32 %v3896_v20, %v1449_v38 }
 0xbef   :  { %v1461_v42 = vpop.xlane.xlu1 %1460 }
 0xbf0   :  { %v1469_v44 = vmul.f32 0.05, %v1461_v42  ;;  %v1472_v46 = vmul.f32 %v1448_v41, %v1448_v41  ;;  %v1480_v14 = vsub.f32 %v3899_v4, %v1448_v41 }
 0xbf1   :  { %v1458_v45 = vpop.xlane.xlu0 %1457 }
 0xbf2   :  { %v1477_v47 = vsub.f32 %v1469_v44, %v1473_v43  ;;  %v1468_v56 = vmul.f32 0.05, %v1458_v45 }
 0xbf3   :  { %v1447_v55 = vpop.xlane.xlu1 %1446 }
 0xbf4   :  { %v1485_v48 = vadd.f32 1e-05, %v1477_v47  ;;  %v1476_v53 = vsub.f32 %v1468_v56, %v1472_v46  ;;  %v1451_v54 = vmul.f32 0.05, %v1447_v55 }
 0xbf5   :  { %v1444_v49 = vpop.xlane.xlu0 %1443 }
 0xbf6   :  { %3342 = vrsqrt.f32 %v1485_v48  ;;  %v1484_v51 = vadd.f32 1e-05, %v1476_v53  ;;  %v1450_v57 = vmul.f32 0.05, %v1444_v49  ;;  %v1475_v59 = vmul.f32 %v1451_v54, %v1451_v54 }
 0xbf7   :  { %v1467_v58 = vpop.xlane.xlu1 %1466  ;;  %v1483_v22 = vsub.f32 %v3911_v28, %v1451_v54 }
 0xbf8   :  { %3344 = vrsqrt.f32 %v1484_v51  ;;  %v1471_v60 = vmul.f32 0.05, %v1467_v58  ;;  %v1474_v0 = vmul.f32 %v1450_v57, %v1450_v57  ;;  %v1482_v6 = vsub.f32 %v3915_v39, %v1450_v57 }
 0xbf9   :  { %v1464_v62 = vpop.xlane.xlu0 %1463 }
 0xbfa   :  { %v1479_v1 = vsub.f32 %v1471_v60, %v1475_v59  ;;  %v1470_v3 = vmul.f32 0.05, %v1464_v62 }
 0xbfc   :  { %v1487_v8 = vadd.f32 1e-05, %v1479_v1  ;;  %v1478_v10 = vsub.f32 %v1470_v3, %v1474_v0 }
 0xbfe   :  { %3346 = vrsqrt.f32 %v1487_v8  ;;  %v1486_v11 = vadd.f32 1e-05, %v1478_v10 }
 0xc00   :  { %3348 = vrsqrt.f32 %v1486_v11 }
 0xc03   :  { %v3343_v13 = vpop.eup %3342 }
 0xc04   :  { %v1493_v15 = vmul.f32 %v3343_v13, %v1481_v12 }
 0xc05   :  { %v3345_v17 = vpop.eup %3344 }
 0xc06   :  { %v1492_v18 = vmul.f32 %v3345_v17, %v1480_v14  ;;  %v1503_v19 = vmul.f32 %v2822_v16, %v1493_v15 }
 0xc08   :  { %v1502_v21 = vmul.f32 %v2822_v16, %v1492_v18  ;;  %v1513_v7 = vadd.f32 %v2823_v5, %v1503_v19 }
 0xc0a   :  { %v1512_v24 = vadd.f32 %v2823_v5, %v1502_v21 }
 0xc0b   :  { %v3347_v23 = vpop.eup %3346 }
 0xc0c   :  { %3166 = vmatprep.mubr.msk.f32.mxu1 %vm244_vm2, %v1512_v24  ;;  %v1495_v25 = vmul.f32 %v3347_v23, %v1483_v22 }
 0xc0d   :  { %v3349_v26 = vpop.eup %3348  ;;  %3167 = vmatmul.mubr.msk.f32.vlgmr.msra.gmra.mxu1 %vm244_vm2, %v1513_v7 }
 0xc0e   :  { %v1494_v34 = vmul.f32 %v3349_v26, %v1482_v6  ;;  %v1505_v29 = vmul.f32 %v2822_v16, %v1495_v25 }
 0xc10   :  { %v1504_v52 = vmul.f32 %v2822_v16, %v1494_v34  ;;  %v1515_v27 = vadd.f32 %v2823_v5, %v1505_v29 }
 0xc12   :  { %v1514_v30 = vadd.f32 %v2823_v5, %v1504_v52 }
 0xc14   :  { %3169 = vmatprep.mubr.msk.f32.mxu1 %vm244_vm2, %v1514_v30 }
 0xc15   :  { %3170 = vmatmul.mubr.msk.f32.gmra.mxu1 %vm244_vm2, %v1515_v27 }
 0xccd   :  { %v3952_v31 = vpop.f32.mrf.mxu1 }
 0xccf   :  { %v3954_v35 = vpop.f32.mrf.mxu1 }
 0xcd0   :  { %3180 = vmatprep.mubr.msk.f32.mxu0 %vm442_vm4, %v3954_v35 }
 0xcd5   :  { %v3958_v32 = vpop.f32.mrf.mxu1 }
 0xcd6   :  { %1630 = vrot.lane.b32.xlu0 %v3958_v32, %s3426_s22 }
 0xcd7   :  { %v3962_v33 = vpop.f32.mrf.mxu1 }
 0xcd8   :  { %1628 = vrot.lane.b32.xlu1 %v3962_v33, %s3426_s22 }
 0xcdc   :  { %1626 = vrot.lane.b32.xlu1 %v3952_v31, %s3426_s22 }
 0xce0   :  { %1624 = vrot.lane.b32.xlu1 %v3954_v35, %s3426_s22 }
 0xd48   :  { %v1631_v36 = vpop.permute.xlu0 %1630 }
 0xd49   :  { %3172 = vmatprep.subr.msk.mxu0 %vm442_vm4, %v1631_v36 }
 0xd4a   :  { %3173 = vmatpush3.xpose.msk.msra.mxu0 %vm442_vm4, %v1631_v36  ;;  %v1629_v37 = vpop.permute.xlu1 %1628 }
 0xd4b   :  { %3174 = vmatprep.subr.msk.mxu0 %vm442_vm4, %v1629_v37 }
 0xd4e   :  { %3175 = vmatpush3.xpose.msk.msra.mxu0 %vm442_vm4, %v1629_v37  ;;  %v1627_v50 = vpop.permute.xlu1 %1626 }
 0xd4f   :  { %3176 = vmatprep.subr.msk.mxu0 %vm442_vm4, %v1627_v50 }
 0xd52   :  { %3177 = vmatpush3.xpose.msk.msra.mxu0 %vm442_vm4, %v1627_v50  ;;  %v1625_v38 = vpop.permute.xlu1 %1624 }
 0xd53   :  { %3178 = vmatprep.subr.msk.mxu0 %vm442_vm4, %v1625_v38 }
 0xd56   :  { %3179 = vmatpush3.xpose.msk.msra.mxu0 %vm442_vm4, %v1625_v38 }
 0xd59   :  { %3181 = vmatmul.mubr.msk.f32.vlgmr.msra.gmra.mxu0 %vm442_vm4, %v3952_v31 }
 0xd5a   :  { %3183 = vmatprep.mubr.msk.f32.mxu0 %vm442_vm4, %v3962_v33 }
 0xd5d   :  { %3184 = vmatmul.mubr.msk.f32.gmra.mxu0 %vm442_vm4, %v3958_v32 }
 0xe19   :  { %v3182_v40 = vpop.f32.mrf.mxu0 }
 0xe1a   :  { %v1720_v41 = vadd.f32 %v3182_v40, %v3684_v61 }
 0xe1b   :  { %v1714_v42 = vpop.f32.mrf.mxu0 }
 0xe1c   :  { %v1715_v43 = vadd.f32 %v1714_v42, %v3689_v63  ;;  %v1736_v44 = vsel %vm544_vm5, %v1720_v41, -inf }
 0xe1d   :  { %1737 = vmax.xlane.f32.xlu1 %v1736_v44  ;;  %v3185_v45 = vpop.f32.mrf.mxu0 }
 0xe1e   :  { %v1730_v46 = vadd.f32 %v3185_v45, %v3695_v2  ;;  %v1733_v47 = vsel %vm544_vm5, %v1715_v43, -inf  ;;  %v3400_v45 = vld [vmem:[%s4245_s2 + $0x8] sm:$0xff] }
 0xe1f   :  { %v1724_v56 = vpop.f32.mrf.mxu0  ;;  %1734 = vmax.xlane.f32.xlu0 %v1733_v47 }
 0xe20   :  { %v1725_v55 = vadd.f32 %v1724_v56, %v3704_v9  ;;  %v1742_v48 = vsel %vm544_vm5, %v1730_v46, -inf  ;;  %v3401_v56 = vld [vmem:[%s4245_s2] sm:$0xff] }
 0xe22   :  { %v1739_v61 = vsel %vm544_vm5, %v1725_v55, -inf }
 0xe23   :  { %1743 = vmax.xlane.f32.xlu0 %v1742_v48 }
 0xe27   :  { %1740 = vmax.xlane.f32.xlu0 %v1739_v61 }
 0xe2e   :  { %1781 = vrot.lane.b32.xlu1 %v3962_v33, %s3427_s30 }
 0xe32   :  { %1779 = vrot.lane.b32.xlu1 %v3952_v31, %s3427_s30 }
 0xe36   :  { %1777 = vrot.lane.b32.xlu1 %v3954_v35, %s3427_s30 }
 0xe3d   :  { %1783 = vrot.lane.b32.xlu0 %v3958_v32, %s3427_s30 }
 0xea6   :  { %v1738_v63 = vpop.xlane.xlu1 %1737 }
 0xea7   :  { %v1746_v2 = vsub.f32 %v1720_v41, %v1738_v63 }
 0xea8   :  { %v1735_v9 = vpop.xlane.xlu0 %1734 }
 0xea9   :  { %v1751_v53 = vmul.f32 1.442695, %v1746_v2  ;;  %v1745_v54 = vsub.f32 %v1715_v43, %v1735_v9  ;;  %v3402_v9 = vld [vmem:[%s4245_s2 + $0x10] sm:$0xff] }
 0xeaa   :  { %v1782_v57 = vpop.permute.xlu1 %1781 }
 0xeab   :  { %3350 = vpow2.f32 %v1751_v53  ;;  %v1749_v49 = vmul.f32 1.442695, %v1745_v54  ;;  %v3403_v54 = vld [vmem:[%s4245_s2 + $0x18] sm:$0xff] }
 0xeac   :  { %v1744_v51 = vpop.xlane.xlu0 %1743 }
 0xead   :  { %3352 = vpow2.f32 %v1749_v49  ;;  %v1748_v10 = vsub.f32 %v1730_v46, %v1744_v51 }
 0xeae   :  { %v1780_v59 = vpop.permute.xlu1 %1779 }
 0xeaf   :  { %v1755_v12 = vmul.f32 1.442695, %v1748_v10 }
 0xeb0   :  { %v1741_v58 = vpop.xlane.xlu0 %1740 }
 0xeb1   :  { %v1747_v11 = vsub.f32 %v1725_v55, %v1741_v58  ;;  %3354 = vpow2.f32 %v1755_v12 }
 0xeb2   :  { %v1778_v3 = vpop.permute.xlu1 %1777 }
 0xeb3   :  { %v1753_v13 = vmul.f32 1.442695, %v1747_v11 }
 0xeb4   :  { %v1784_v60 = vpop.permute.xlu0 %1783 }
 0xeb5   :  { %3186 = vmatprep.subr.mxu1 %v1784_v60  ;;  %3356 = vpow2.f32 %v1753_v13 }
 0xeb6   :  { %3187 = vmatpush3.msra.mxu1 %v1784_v60 }
 0xeb7   :  { %3188 = vmatprep.subr.mxu1 %v1782_v57 }
 0xeb8   :  { %v3351_v62 = vpop.eup %3350  ;;  %3189 = vmatpush3.msra.mxu1 %v1782_v57 }
 0xeb9   :  { %3190 = vmatprep.subr.mxu1 %v1780_v59  ;;  %v1760_v0 = vsel %vm544_vm5, %v3351_v62, 0.0 }
 0xeba   :  { %v3353_v1 = vpop.eup %3352  ;;  %1761 = vadd.xlane.f32.xlu1 %v1760_v0  ;;  %3191 = vmatpush3.msra.mxu1 %v1780_v59 }
 0xebb   :  { %3192 = vmatprep.subr.mxu1 %v1778_v3  ;;  %v1757_v8 = vsel %vm544_vm5, %v3353_v1, 0.0 }
 0xebc   :  { %1758 = vadd.xlane.f32.xlu0 %v1757_v8  ;;  %3193 = vmatpush3.msra.mxu1 %v1778_v3 }
 0xebe   :  { %v3355_v14 = vpop.eup %3354 }
 0xebf   :  { %v1766_v16 = vsel %vm544_vm5, %v3355_v14, 0.0 }
 0xec2   :  { %v3357_v15 = vpop.eup %3356 }
 0xec3   :  { %v1763_v17 = vsel %vm544_vm5, %v3357_v15, 0.0 }
 0xecb   :  { %1898 = vrot.lane.b32.xlu1 %v3962_v33, %s3428_s26 }
 0xed2   :  { %1900 = vrot.lane.b32.xlu0 %v3958_v32, %s3428_s26 }
 0xeef   :  { %1767 = vadd.xlane.f32.xlu1 %v1766_v16 }
 0xef1   :  { %1764 = vadd.xlane.f32.xlu0 %v1763_v17 }
 0xf00   :  { %1894 = vrot.lane.b32.xlu1 %v3954_v35, %s3428_s26 }
 0xf04   :  { %1888 = vrot.lane.b32.xlu1 %v3952_v31, %s3429_s0 }
 0xf07   :  { %1896 = vrot.lane.b32.xlu0 %v3952_v31, %s3428_s26  ;;  %s3434_s26 = smov [#allocation2]  }
 0xf08   :  { %1892 = vrot.lane.b32.xlu1 %v3958_v32, %s3429_s0 }
 0xf0b   :  { %1886 = vrot.lane.b32.xlu0 %v3954_v35, %s3429_s0 }
 0xf0f   :  { %1890 = vrot.lane.b32.xlu0 %v3962_v33, %s3429_s0  ;;  %s2753_s0 = sshll.u32 %s3434_s26, 4  ;;  %s2754_s0 = int_to_ptr.vmem [resolvable:$true] %s2753_s0 }
 0xf10   :  { %p3409_p1 = scmp.lt.s32.totalorder %s2754_s0, %s2754_s0 }
 0xf43   :  { %v1762_v18 = vpop.xlane.xlu1 %1761 }
 0xf44   :  { %3358 = vrcp.f32 %v1762_v18 }
 0xf45   :  { %v1759_v19 = vpop.xlane.xlu0 %1758 }
 0xf46   :  { %3360 = vrcp.f32 %v1759_v19 }
 0xf47   :  { %v1899_v7 = vpop.permute.xlu1 %1898 }
 0xf49   :  { %v1901_v5 = vpop.permute.xlu0 %1900 }
 0xf4a   :  { %3200 = vmatprep.subr.msk.mxu1 %vm442_vm4, %v1901_v5 }
 0xf51   :  { %v3359_v21 = vpop.eup %3358 }
 0xf52   :  { %v1774_v23 = vmul.f32 %v3359_v21, %v3351_v62 }
 0xf53   :  { %v3361_v22 = vpop.eup %3360 }
 0xf54   :  { %v1773_v24 = vmul.f32 %v3361_v22, %v3353_v1 }
 0xf56   :  { %3194 = vmatprep.mubr.msk.f32.mxu1 %vm544_vm5, %v1773_v24 }
 0xf57   :  { %3195 = vmatmul.mubr.msk.f32.vlgmr.msra.gmra.mxu1 %vm544_vm5, %v1774_v23 }
 0xf58   :  { %3201 = vmatpush3.xpose.msk.msra.mxu1 %vm442_vm4, %v1901_v5 }
 0xf59   :  { %3202 = vmatprep.subr.msk.mxu1 %vm442_vm4, %v1899_v7 }
 0xf5c   :  { %3203 = vmatpush3.xpose.msk.msra.mxu1 %vm442_vm4, %v1899_v7 }
 0xf78   :  { %v1768_v6 = vpop.xlane.xlu1 %1767 }
 0xf79   :  { %3362 = vrcp.f32 %v1768_v6 }
 0xf7a   :  { %v1765_v25 = vpop.xlane.xlu0 %1764 }
 0xf7b   :  { %3364 = vrcp.f32 %v1765_v25 }
 0xf7c   :  { %v1895_v34 = vpop.permute.xlu1 %1894 }
 0xf7e   :  { %v1897_v26 = vpop.permute.xlu0 %1896 }
 0xf7f   :  { %3204 = vmatprep.subr.msk.mxu1 %vm442_vm4, %v1897_v26 }
 0xf80   :  { %3205 = vmatpush3.xpose.msk.msra.mxu1 %vm442_vm4, %v1897_v26  ;;  %v1889_v37 = vpop.permute.xlu1 %1888 }
 0xf81   :  { %3206 = vmatprep.subr.msk.mxu1 %vm442_vm4, %v1895_v34 }
 0xf82   :  { %v1887_v27 = vpop.permute.xlu0 %1886 }
 0xf84   :  { %3207 = vmatpush3.xpose.msk.msra.mxu1 %vm442_vm4, %v1895_v34  ;;  %v1893_v38 = vpop.permute.xlu1 %1892 }
 0xf86   :  { %v3363_v29 = vpop.eup %3362  ;;  %v1891_v50 = vpop.permute.xlu0 %1890 }
 0xf87   :  { %v1776_v36 = vmul.f32 %v3363_v29, %v3355_v14 }
 0xf88   :  { %v3365_v52 = vpop.eup %3364 }
 0xf89   :  { %v1775_v30 = vmul.f32 %v3365_v52, %v3357_v15 }
 0xf8b   :  { %3197 = vmatprep.mubr.msk.f32.mxu1 %vm544_vm5, %v1775_v30 }
 0xf8c   :  { %3198 = vmatmul.mubr.msk.f32.gmra.mxu1 %vm544_vm5, %v1776_v36  ;;  %v2859_v36 = vld [vmem:[%s4219_s8 + $0x38] sm:$0xff] }
 0xf8d   :  { %3208 = vmatprep.mubr.msk.f32.mxu1 %vm442_vm4, %v1887_v27 }
 0xf90   :  { %3209 = vmatmul.mubr.msk.f32.vlgmr.msra.gmra.mxu1 %vm442_vm4, %v1889_v37  ;;  %v2858_v37 = vld [vmem:[%s4219_s8 + $0x30] sm:$0xff] }
 0xf91   :  { %3211 = vmatprep.mubr.msk.f32.mxu1 %vm442_vm4, %v1891_v50  ;;  %v2857_v50 = vld [vmem:[%s4219_s8 + $0x28] sm:$0xff] }
 0xf94   :  { %3212 = vmatmul.mubr.msk.f32.gmra.mxu1 %vm442_vm4, %v1893_v38  ;;  %v2856_v38 = vld [vmem:[%s4219_s8 + $0x20] sm:$0xff] }
0x1017   :  { %v4036_v40 = vpop.f32.mrf.mxu1 }
0x1019   :  { %v4038_v41 = vpop.f32.mrf.mxu1 }
0x104c   :  { %v4040_v42 = vpop.f32.mrf.mxu1 }
0x104e   :  { %v4042_v43 = vpop.f32.mrf.mxu1 }
0x1050   :  { %v3210_v44 = vpop.f32.mrf.mxu1 }
0x1051   :  { %v1990_v46 = vadd.f32 %v3400_v45, %v3210_v44 }
0x1052   :  { %v1984_v47 = vpop.f32.mrf.mxu1 }
0x1053   :  { %v1985_v55 = vadd.f32 %v3401_v56, %v1984_v47  ;;  %v2006_v48 = vsel %vm544_vm5, %v1990_v46, -inf }
0x1054   :  { %2007 = vmax.xlane.f32.xlu1 %v2006_v48  ;;  %v3213_v61 = vpop.f32.mrf.mxu1 }
0x1055   :  { %v2003_v63 = vsel %vm544_vm5, %v1985_v55, -inf  ;;  %v2000_v49 = vadd.f32 %v3403_v54, %v3213_v61 }
0x1056   :  { %2004 = vmax.xlane.f32.xlu0 %v2003_v63  ;;  %v1994_v2 = vpop.f32.mrf.mxu1 }
0x1057   :  { %v1995_v53 = vadd.f32 %v3402_v9, %v1994_v2  ;;  %v2012_v57 = vsel %vm544_vm5, %v2000_v49, -inf }
0x1059   :  { %v2009_v51 = vsel %vm544_vm5, %v1995_v53, -inf }
0x105a   :  { %2010 = vmax.xlane.f32.xlu0 %v2009_v51 }
0x105e   :  { %2013 = vmax.xlane.f32.xlu0 %v2012_v57 }
0x10dd   :  { %v2008_v58 = vpop.xlane.xlu1 %2007 }
0x10de   :  { %v2016_v59 = vsub.f32 %v1990_v46, %v2008_v58 }
0x10df   :  { %v2005_v60 = vpop.xlane.xlu0 %2004 }
0x10e0   :  { %v2021_v62 = vmul.f32 1.442695, %v2016_v59  ;;  %v2015_v0 = vsub.f32 %v1985_v55, %v2005_v60 }
0x10e2   :  { %3366 = vpow2.f32 %v2021_v62  ;;  %v2019_v1 = vmul.f32 1.442695, %v2015_v0 }
0x10e3   :  { %v2011_v3 = vpop.xlane.xlu0 %2010 }
0x10e4   :  { %3368 = vpow2.f32 %v2019_v1  ;;  %v2017_v8 = vsub.f32 %v1995_v53, %v2011_v3 }
0x10e6   :  { %v2023_v10 = vmul.f32 1.442695, %v2017_v8 }
0x10e7   :  { %v2014_v11 = vpop.xlane.xlu0 %2013 }
0x10e8   :  { %3370 = vpow2.f32 %v2023_v10  ;;  %v2018_v12 = vsub.f32 %v2000_v49, %v2014_v11 }
0x10ea   :  { %v2025_v13 = vmul.f32 1.442695, %v2018_v12 }
0x10ec   :  { %3372 = vpow2.f32 %v2025_v13 }
0x10ef   :  { %v3367_v14 = vpop.eup %3366 }
0x10f0   :  { %v2030_v15 = vsel %vm544_vm5, %v3367_v14, 0.0 }
0x10f1   :  { %v3369_v16 = vpop.eup %3368  ;;  %2031 = vadd.xlane.f32.xlu1 %v2030_v15  ;;  %v2872_v15 = vld [vmem:[%s4223_s12 + $0x28] sm:$0xf] }
0x10f2   :  { %v2027_v17 = vsel %vm544_vm5, %v3369_v16, 0.0  ;;  %3242 = vmatprep.subr.msk.mxu1 %vm341_vm3, %v2872_v15 }
0x10f3   :  { %2028 = vadd.xlane.f32.xlu0 %v2027_v17  ;;  %3243 = vmatpush3.msk.msra.mxu1 %vm341_vm3, %v2872_v15  ;;  %v2870_v17 = vld [vmem:[%s4223_s12 + $0x18] sm:$0xff] }
0x10f5   :  { %v3371_v18 = vpop.eup %3370 }
0x10f6   :  { %v2033_v19 = vsel %vm544_vm5, %v3371_v18, 0.0 }
0x10f7   :  { %2034 = vadd.xlane.f32.xlu0 %v2033_v19 }
0x10f9   :  { %v3373_v5 = vpop.eup %3372 }
0x10fa   :  { %v2036_v21 = vsel %vm544_vm5, %v3373_v5, 0.0 }
0x10fb   :  { %2037 = vadd.xlane.f32.xlu1 %v2036_v21 }
0x110c   :  { %2051 = vrot.lane.b32.xlu1 %v3962_v33, %s3430_s21 }
0x110d   :  { %2053 = vrot.lane.b32.xlu0 %v3958_v32, %s3430_s21 }
0x1110   :  { %2049 = vrot.lane.b32.xlu1 %v3952_v31, %s3430_s21 }
0x1114   :  { %2047 = vrot.lane.b32.xlu1 %v3954_v35, %s3430_s21 }
0x117a   :  { %v2032_v24 = vpop.xlane.xlu1 %2031 }
0x117c   :  { %v2029_v22 = vpop.xlane.xlu0 %2028 }
0x117d   :  { %3374 = vrcp.f32 %v2029_v22 }
0x117e   :  { %3376 = vrcp.f32 %v2032_v24 }
0x1180   :  { %v2035_v23 = vpop.xlane.xlu0 %2034 }
0x1181   :  { %3378 = vrcp.f32 %v2035_v23 }
0x1184   :  { %v2038_v7 = vpop.xlane.xlu1 %2037  ;;  %v2054_v6 = vpop.permute.xlu0 %2053 }
0x1185   :  { %3380 = vrcp.f32 %v2038_v7  ;;  %3214 = vmatprep.subr.mxu0 %v2054_v6 }
0x1186   :  { %3215 = vmatpush3.msra.mxu0 %v2054_v6 }
0x1188   :  { %v2052_v33 = vpop.permute.xlu1 %2051 }
0x1189   :  { %3216 = vmatprep.subr.mxu0 %v2052_v33 }
0x118a   :  { %v3375_v32 = vpop.eup %3374  ;;  %3217 = vmatpush3.msra.mxu0 %v2052_v33 }
0x118b   :  { %v2043_v25 = vmul.f32 %v3375_v32, %v3369_v16  ;;  %v3377_v35 = vpop.eup %3376  ;;  %v2871_v16 = vld [vmem:[%s4223_s12 + $0x20] sm:$0xff] }
0x118c   :  { %v2050_v31 = vpop.permute.xlu1 %2049  ;;  %v2044_v29 = vmul.f32 %v3377_v35, %v3367_v14  ;;  %3244 = vmatprep.subr.mxu1 %v2871_v16 }
0x118d   :  { %3218 = vmatprep.subr.mxu0 %v2050_v31  ;;  %3222 = vmatprep.mubr.msk.f32.mxu0 %vm544_vm5, %v2043_v25 }
0x118e   :  { %3219 = vmatpush3.msra.mxu0 %v2050_v31  ;;  %v3379_v26 = vpop.eup %3378  ;;  %3245 = vmatpush3.msra.mxu1 %v2871_v16 }
0x118f   :  { %v2045_v30 = vmul.f32 %v3379_v26, %v3371_v18  ;;  %3246 = vmatprep.subr.mxu1 %v2870_v17 }
0x1190   :  { %v2048_v34 = vpop.permute.xlu1 %2047  ;;  %3247 = vmatpush3.msra.mxu1 %v2870_v17 }
0x1191   :  { %3220 = vmatprep.subr.mxu0 %v2048_v34 }
0x1192   :  { %v3381_v52 = vpop.eup %3380  ;;  %3221 = vmatpush3.msra.mxu0 %v2048_v34 }
0x1193   :  { %3223 = vmatmul.mubr.msk.f32.vlgmr.msra.gmra.mxu0 %vm544_vm5, %v2044_v29  ;;  %v2046_v27 = vmul.f32 %v3381_v52, %v3373_v5  ;;  %3228 = vmatprep.subr.mxu0 %v2859_v36 }
0x1194   :  { %3225 = vmatprep.mubr.msk.f32.mxu0 %vm544_vm5, %v2045_v30  ;;  %3229 = vmatpush3.msra.mxu0 %v2859_v36 }
0x1195   :  { %3230 = vmatprep.subr.mxu0 %v2858_v37 }
0x1196   :  { %3231 = vmatpush3.msra.mxu0 %v2858_v37 }
0x1197   :  { %3226 = vmatmul.mubr.msk.f32.gmra.mxu0 %vm544_vm5, %v2046_v27  ;;  %3232 = vmatprep.subr.mxu0 %v2857_v50 }
0x1198   :  { %3233 = vmatpush3.msra.mxu0 %v2857_v50 }
0x1199   :  { %3234 = vmatprep.subr.mxu0 %v2856_v38 }
0x119a   :  { %3235 = vmatpush3.msra.mxu0 %v2856_v38 }
0x1253   :  { %v3224_v44 = vpop.f32.mrf.mxu0 }
0x1254   :  { %2162 = vrot.lane.b32.xlu1 %v3224_v44, %s3431_s29 }
0x1255   :  { %v2137_v45 = vpop.f32.mrf.mxu0 }
0x1256   :  { %2160 = vrot.lane.b32.xlu0 %v2137_v45, %s3431_s29 }
0x1257   :  { %v3227_v46 = vpop.f32.mrf.mxu0 }
0x1258   :  { %2166 = vrot.lane.b32.xlu1 %v3227_v46, %s3431_s29 }
0x1259   :  { %v2147_v47 = vpop.f32.mrf.mxu0 }
0x125a   :  { %2164 = vrot.lane.b32.xlu0 %v2147_v47, %s3431_s29 }
0x12c6   :  { %v2163_v56 = vpop.permute.xlu1 %2162 }
0x12c7   :  { %v2173_v61 = vsel %vm442_vm4, %v4036_v40, %v2163_v56  ;;  %v2865_v40 = vld [vmem:[%s4220_s9 + $0x1] ss:$0 sm:$0xff] }
0x12c8   :  { %v2161_v55 = vpop.permute.xlu0 %2160 }
0x12c9   :  { %v2172_v48 = vsel %vm442_vm4, %v4038_v41, %v2161_v55 }
0x12ca   :  { %3236 = vmatprep.mubr.msk.f32.mxu0 %vm544_vm5, %v2172_v48  ;;  %v2167_v63 = vpop.permute.xlu1 %2166 }
0x12cb   :  { %3237 = vmatmul.mubr.msk.f32.vlgmr.msra.gmra.mxu0 %vm544_vm5, %v2173_v61  ;;  %v2175_v53 = vsel %vm442_vm4, %v4040_v42, %v2167_v63  ;;  %v2868_v63 = vld [vmem:[%s4221_s10 + $0x1] ss:$0 sm:$0xff] }
0x12cc   :  { %v2165_v2 = vpop.permute.xlu0 %2164 }
0x12cd   :  { %v2174_v9 = vsel %vm442_vm4, %v4042_v43, %v2165_v2 }
0x12ce   :  { %3239 = vmatprep.mubr.msk.f32.mxu0 %vm544_vm5, %v2174_v9 }
0x12cf   :  { %3240 = vmatmul.mubr.msk.f32.gmra.mxu0 %vm544_vm5, %v2175_v53 }
0x138b   :  { %v3238_v41 = vpop.f32.mrf.mxu0 }
0x138c   :  { %v2279_v54 = vadd.f32 %v3238_v41, %v3896_v20 }
0x138d   :  { %v2259_v49 = vpop.f32.mrf.mxu0 }
0x138e   :  { %v4108_v51 = vadd.f32 %v2865_v40, %v2279_v54  ;;  %v2278_v57 = vadd.f32 %v2259_v49, %v3899_v4 }
0x138f   :  { %v3241_v43 = vpop.f32.mrf.mxu0 }
0x1390   :  { %v4111_v58 = vadd.f32 %v2865_v40, %v2278_v57  ;;  %v2281_v42 = vadd.f32 %v3241_v43, %v3911_v28  ;;  %v2301_v59 = vsel %vm244_vm2, %v4108_v51, 0.0  ;;  %v2315_v20 = vmul.f32 %v4108_v51, %v4108_v51 }
0x1391   :  { %2302 = vadd.xlane.f32.xlu1 %v2301_v59  ;;  %v2269_v0 = vpop.f32.mrf.mxu0 }
0x1392   :  { %v4116_v60 = vadd.f32 %v2865_v40, %v2281_v42  ;;  %v2298_v62 = vsel %vm244_vm2, %v4111_v58, 0.0  ;;  %v2280_v1 = vadd.f32 %v2269_v0, %v3915_v39  ;;  %v2321_v3 = vsel %vm244_vm2, %v2315_v20, 0.0 }
0x1393   :  { %2299 = vadd.xlane.f32.xlu0 %v2298_v62  ;;  %v2314_v8 = vmul.f32 %v4111_v58, %v4111_v58 }
0x1394   :  { %v2307_v4 = vsel %vm244_vm2, %v4116_v60, 0.0  ;;  %v2317_v28 = vmul.f32 %v4116_v60, %v4116_v60  ;;  %v4131_v11 = vadd.f32 %v2865_v40, %v2280_v1  ;;  %v2869_v40 = vld [vmem:[%s4222_s11 + $0x1] ss:$0 sm:$0xff]  ;;  %v2882_v1 = vld [vmem:[%s4225_s14 + $0x30] sm:$0xff] }
0x1395   :  { %2308 = vadd.xlane.f32.xlu1 %v2307_v4  ;;  %v2318_v12 = vsel %vm244_vm2, %v2314_v8, 0.0  ;;  %v2880_v8 = vld [vmem:[%s4225_s14 + $0x20] sm:$0xff] }
0x1396   :  { %v2327_v10 = vsel %vm244_vm2, %v2317_v28, 0.0  ;;  %v2304_v13 = vsel %vm244_vm2, %v4131_v11, 0.0  ;;  %v2316_v39 = vmul.f32 %v4131_v11, %v4131_v11 }
0x1397   :  { %2322 = vadd.xlane.f32.xlu0 %v2321_v3  ;;  %v2881_v3 = vld [vmem:[%s4225_s14 + $0x28] sm:$0xff] }
0x1398   :  { %v2324_v14 = vsel %vm244_vm2, %v2316_v39, 0.0 }
0x1399   :  { %2328 = vadd.xlane.f32.xlu1 %v2327_v10  ;;  %v2874_v10 = vld [vmem:[%s4224_s13 + $0x1] ss:$0 sm:$0xff] }
0x139b   :  { %2319 = vadd.xlane.f32.xlu0 %v2318_v12 }
0x139f   :  { %2305 = vadd.xlane.f32.xlu0 %v2304_v13 }
0x13a3   :  { %2325 = vadd.xlane.f32.xlu0 %v2324_v14 }
0x141a   :  { %v2303_v18 = vpop.xlane.xlu1 %2302 }
0x141b   :  { %v2311_v5 = vmul.f32 0.05, %v2303_v18 }
0x141c   :  { %v2300_v19 = vpop.xlane.xlu0 %2299 }
0x141d   :  { %v2335_v23 = vmul.f32 %v2311_v5, %v2311_v5  ;;  %v2310_v7 = vmul.f32 0.05, %v2300_v19  ;;  %v2343_v55 = vsub.f32 %v4108_v51, %v2311_v5 }
0x141e   :  { %v2309_v21 = vpop.xlane.xlu1 %2308 }
0x141f   :  { %v2313_v22 = vmul.f32 0.05, %v2309_v21  ;;  %v2334_v26 = vmul.f32 %v2310_v7, %v2310_v7  ;;  %v2342_v61 = vsub.f32 %v4111_v58, %v2310_v7 }
0x1420   :  { %v2323_v24 = vpop.xlane.xlu0 %2322 }
0x1421   :  { %v2331_v6 = vmul.f32 0.05, %v2323_v24  ;;  %v2337_v31 = vmul.f32 %v2313_v22, %v2313_v22  ;;  %v2345_v49 = vsub.f32 %v4116_v60, %v2313_v22  ;;  %v2883_v60 = vld [vmem:[%s4225_s14 + $0x38] sm:$0xff] }
0x1422   :  { %v2329_v33 = vpop.xlane.xlu1 %2328  ;;  %3254 = vmatprep.subr.mxu0 %v2883_v60 }
0x1423   :  { %v2339_v32 = vsub.f32 %v2331_v6, %v2335_v23  ;;  %v2333_v25 = vmul.f32 0.05, %v2329_v33  ;;  %3255 = vmatpush3.msra.mxu0 %v2883_v60 }
0x1424   :  { %v2320_v35 = vpop.xlane.xlu0 %2319  ;;  %3256 = vmatprep.subr.mxu0 %v2882_v1 }
0x1425   :  { %v2347_v34 = vadd.f32 1e-05, %v2339_v32  ;;  %v2330_v29 = vmul.f32 0.05, %v2320_v35  ;;  %v2341_v52 = vsub.f32 %v2333_v25, %v2337_v31  ;;  %3257 = vmatpush3.msra.mxu0 %v2882_v1  ;;  %v2892_v1 = vld [vmem:[%s4230_s19] ss:$0 sm:$0xff] }
0x1426   :  { %3258 = vmatprep.subr.mxu0 %v2881_v3 }
0x1427   :  { %3382 = vrsqrt.f32 %v2347_v34  ;;  %v2338_v30 = vsub.f32 %v2330_v29, %v2334_v26  ;;  %v2349_v50 = vadd.f32 1e-05, %v2341_v52  ;;  %3259 = vmatpush3.msra.mxu0 %v2881_v3 }
0x1428   :  { %v2306_v27 = vpop.xlane.xlu0 %2305  ;;  %3260 = vmatprep.subr.mxu0 %v2880_v8 }
0x1429   :  { %v2346_v36 = vadd.f32 1e-05, %v2338_v30  ;;  %v2312_v37 = vmul.f32 0.05, %v2306_v27  ;;  %3261 = vmatpush3.msra.mxu0 %v2880_v8 }
0x142b   :  { %3384 = vrsqrt.f32 %v2346_v36  ;;  %v2336_v44 = vmul.f32 %v2312_v37, %v2312_v37  ;;  %v2344_v42 = vsub.f32 %v4131_v11, %v2312_v37 }
0x142c   :  { %v2326_v38 = vpop.xlane.xlu0 %2325  ;;  %3386 = vrsqrt.f32 %v2349_v50 }
0x142d   :  { %v2332_v45 = vmul.f32 0.05, %v2326_v38 }
0x142f   :  { %v2340_v46 = vsub.f32 %v2332_v45, %v2336_v44 }
0x1431   :  { %v2348_v47 = vadd.f32 1e-05, %v2340_v46 }
0x1433   :  { %3388 = vrsqrt.f32 %v2348_v47  ;;  %v2889_v47 = vld [vmem:[%s4226_s15 + $0x1] ss:$0 sm:$0xff] }
0x1434   :  { %v3383_v56 = vpop.eup %3382 }
0x1435   :  { %v2355_v48 = vmul.f32 %v3383_v56, %v2343_v55 }
0x1437   :  { %v2365_v53 = vmul.f32 %v2868_v63, %v2355_v48 }
0x1438   :  { %v3385_v2 = vpop.eup %3384 }
0x1439   :  { %v2354_v9 = vmul.f32 %v3385_v2, %v2342_v61  ;;  %v3387_v41 = vpop.eup %3386  ;;  %v2375_v51 = vadd.f32 %v2869_v40, %v2365_v53  ;;  %v3432_v53 = vmov 0.0  }
0x143a   :  { %v2357_v43 = vmul.f32 %v3387_v41, %v2345_v49  ;;  %3268 = vmatprep.subr.mxu1 %v3432_v53  ;;  %v2659_v41 = vld [vmem:[%s4229_s18] sm:$0xff] }
0x143b   :  { %v2364_v54 = vmul.f32 %v2868_v63, %v2354_v9 }
0x143c   :  { %v2367_v20 = vmul.f32 %v2868_v63, %v2357_v43 }
0x143d   :  { %v2374_v57 = vadd.f32 %v2869_v40, %v2364_v54 }
0x143e   :  { %v2377_v28 = vadd.f32 %v2869_v40, %v2367_v20  ;;  %v2890_v20 = vld [vmem:[%s4227_s16] ss:$0 sm:$0xff]  ;;  %s3404_s16 = scalar_lea.vmem %s2754_s0, 32 }
0x143f   :  { %3248 = vmatprep.mubr.msk.f32.mxu1 %vm244_vm2, %v2374_v57  ;;  %p3405_p0 = scmp.ne.s32.totalorder %s2754_s0, %s3404_s16  ;;  %p3410_p2 = scmp.lt.s32.totalorder %s3404_s16, %s3404_s16 }
0x1440   :  { %v3389_v59 = vpop.eup %3388  ;;  %3249 = vmatmul.mubr.msk.f32.vlgmr.msra.gmra.mxu1 %vm244_vm2, %v2375_v51 }
0x1441   :  { %v2356_v62 = vmul.f32 %v3389_v59, %v2344_v42  ;;  %p3411_p3 = por %p3410_p2, %p3409_p1 }
0x1443   :  { %v2366_v0 = vmul.f32 %v2868_v63, %v2356_v62  ;;  %p3412_p4 = pnand %p3411_p3, %p3405_p0 }
0x1445   :  { %v2376_v4 = vadd.f32 %v2869_v40, %v2366_v0 }
0x1447   :  { %3251 = vmatprep.mubr.msk.f32.mxu1 %vm244_vm2, %v2376_v4  ;;  %v2891_v4 = vld [vmem:[%s4228_s17] ss:$0 sm:$0xff] }
0x1448   :  { %3252 = vmatmul.mubr.msk.f32.gmra.mxu1 %vm244_vm2, %v2377_v28 }
0x1449   :  { %3274 = vmatprep.mubr.msk.f32.mxu1 %vm3433_vm8, %v3432_v53 }
0x1500   :  { %v3250_v12 = vpop.f32.mrf.mxu1 }
0x1501   :  { %v2477_v13 = vadd.f32 %v3250_v12, %v2874_v10 }
0x1502   :  { %v2471_v39 = vpop.f32.mrf.mxu1 }
0x1503   :  { %v2495_v14 = vmul.f32 0.70710677, %v2477_v13  ;;  %v2472_v15 = vadd.f32 %v2874_v10, %v2471_v39  ;;  %v2491_v32 = vmul.f32 0.5, %v2477_v13 }
0x1505   :  { %3390 = verf.f32 %v2495_v14  ;;  %v2494_v16 = vmul.f32 0.70710677, %v2472_v15  ;;  %v2490_v6 = vmul.f32 0.5, %v2472_v15 }
0x1507   :  { %3392 = verf.f32 %v2494_v16 }
0x1508   :  { %v3253_v17 = vpop.f32.mrf.mxu1 }
0x1509   :  { %v2487_v18 = vadd.f32 %v3253_v17, %v2874_v10 }
0x150a   :  { %v2481_v19 = vpop.f32.mrf.mxu1 }
0x150b   :  { %v2497_v5 = vmul.f32 0.70710677, %v2487_v18  ;;  %v2482_v21 = vadd.f32 %v2874_v10, %v2481_v19  ;;  %v2493_v30 = vmul.f32 0.5, %v2487_v18 }
0x150d   :  { %3394 = verf.f32 %v2497_v5  ;;  %v2496_v22 = vmul.f32 0.70710677, %v2482_v21  ;;  %v2492_v29 = vmul.f32 0.5, %v2482_v21 }
0x150f   :  { %3396 = verf.f32 %v2496_v22 }
0x1512   :  { %v3391_v24 = vpop.eup %3390 }
0x1513   :  { %v2503_v7 = vadd.f32 1.0, %v3391_v24 }
0x1514   :  { %v3393_v23 = vpop.eup %3392 }
0x1515   :  { %v2502_v33 = vadd.f32 1.0, %v3393_v23  ;;  %v2507_v31 = vmul.f32 %v2503_v7, %v2491_v32 }
0x1517   :  { %v2506_v25 = vmul.f32 %v2502_v33, %v2490_v6 }
0x1519   :  { %3262 = vmatprep.mubr.msk.f32.mxu0 %vm544_vm5, %v2506_v25 }
0x151a   :  { %v3395_v35 = vpop.eup %3394  ;;  %3263 = vmatmul.mubr.msk.f32.vlgmr.msra.gmra.mxu0 %vm544_vm5, %v2507_v31 }
0x151b   :  { %v2505_v34 = vadd.f32 1.0, %v3395_v35 }
0x151c   :  { %v3397_v26 = vpop.eup %3396 }
0x151d   :  { %v2504_v52 = vadd.f32 1.0, %v3397_v26  ;;  %v2509_v36 = vmul.f32 %v2505_v34, %v2493_v30 }
0x151f   :  { %v2508_v27 = vmul.f32 %v2504_v52, %v2492_v29 }
0x1521   :  { %3265 = vmatprep.mubr.msk.f32.mxu0 %vm544_vm5, %v2508_v27 }
0x1522   :  { %3266 = vmatmul.mubr.msk.f32.gmra.mxu0 %vm544_vm5, %v2509_v36 }
0x15da   :  { %v3264_v37 = vpop.f32.mrf.mxu0 }
0x15dc   :  { %v2593_v50 = vpop.f32.mrf.mxu0 }
0x15dd   :  { %v2610_v45 = vadd.f32 %v2593_v50, %v4111_v58  ;;  %v2661_v58 = vld [vmem:[%s4229_s18 + $0x10] sm:$0xf] }
0x15de   :  { %3269 = vmatpush3.msk.msra.mxu1 %vm341_vm3, %v2661_v58 }
0x15df   :  { %v2620_v55 = vadd.f32 %v2889_v47, %v2610_v45  ;;  %3270 = vmatprep.subr.mxu1 %v3432_v53 }
0x15e2   :  { %v3267_v38 = vpop.f32.mrf.mxu0 }
0x15e4   :  { %v2602_v44 = vpop.f32.mrf.mxu0 }
0x15e5   :  { %v2611_v46 = vadd.f32 %v2602_v44, %v4131_v11  ;;  %v2660_v11 = vld [vmem:[%s4229_s18 + $0x8] sm:$0xff] }
0x15e6   :  { %3271 = vmatpush3.msra.mxu1 %v2660_v11 }
0x15e7   :  { %v2621_v56 = vadd.f32 %v2889_v47, %v2611_v46  ;;  %3272 = vmatprep.subr.mxu1 %v3432_v53 }
0x15e8   :  { %3273 = vmatpush3.msra.mxu1 %v2659_v41 }
0x15e9   :  { %v2623_v48 = vrot.slane %v2621_v56, 7 }
0x15eb   :  { %v2626_v61 = vsel %vm2625_vm6, %v2620_v55, %v2623_v48 }
0x15ec   :  { %v2630_v63 = vsel %vm2629_vm7, %v2626_v61, 0.0  ;;  %v2634_v2 = vmul.f32 %v2626_v61, %v2626_v61 }
0x15ed   :  { %2631 = vadd.xlane.f32.xlu0 %v2630_v63 }
0x15ee   :  { %v2635_v9 = vsel %vm2629_vm7, %v2634_v2, 0.0 }
0x15ef   :  { %2636 = vadd.xlane.f32.xlu1 %v2635_v9 }
0x1676   :  { %v2632_v40 = vpop.xlane.xlu0 %2631 }
0x1677   :  { %v2633_v54 = vmul.f32 0.05, %v2632_v40 }
0x1678   :  { %v2637_v49 = vpop.xlane.xlu1 %2636 }
0x1679   :  { %v2639_v57 = vmul.f32 %v2633_v54, %v2633_v54  ;;  %v2638_v51 = vmul.f32 0.05, %v2637_v49  ;;  %v2641_v59 = vsub.f32 %v2626_v61, %v2633_v54 }
0x167b   :  { %v2640_v43 = vsub.f32 %v2638_v51, %v2639_v57 }
0x167d   :  { %v2642_v42 = vadd.f32 1e-05, %v2640_v43 }
0x167f   :  { %3398 = vrsqrt.f32 %v2642_v42 }
0x168c   :  { %v3399_v62 = vpop.eup %3398 }
0x168d   :  { %v2644_v0 = vmul.f32 %v3399_v62, %v2641_v59 }
0x168f   :  { %v2651_v28 = vmul.f32 %v2890_v20, %v2644_v0 }
0x1691   :  { %v2658_v60 = vadd.f32 %v2891_v4, %v2651_v28 }
0x1693   :  { %3275 = vmatmul.mubr.msk.f32.vlgmr.msra.gmra.mxu1 %vm244_vm2, %v2658_v60 }
0x1753   :  { %v2741_v3 = vpop.f32.mrf.mxu1 }
0x1754   :  { %v2742_v8 = vadd.f32 %v2892_v1, %v2741_v3 }
0x1755   :  { %v3276_v10 = vpop.f32.mrf.mxu1 }
0x1756   :  { %2746 = vst.msk [vmem:[#allocation2] sm:$0x3] %vm2745_vm9, %v2742_v8 }
0x1757   :  { %3415 = shalt.err (!%p3412_p4)
}
0x1758   :  { %2756 = dma.vmem_to_hbm [thread:$0]  %s2754_s0, 32, %s4231_s20, [#allocation3]  }
0x1759   :  { %3424 = dma.done.wait [#allocation3], 32  }
0x175a   :  { %3425 = vsyncadd [#allocation3], 4294967264 }
0x175b   :  { %2760 = vsyncpa [#allocation3], 1 }

</bundles_post_ra>
